<compile_context>
chip_gen: v6e
topology: v6e:2x2x1
jax: 0.10.0
libtpu: 0.0.40
codegen_flags: <defaults>
</compile_context>

<pallas_src>
import math
import functools

import jax
import jax.numpy as jnp
from jax import lax
from jax.experimental import pallas as pl
from jax.experimental.pallas import tpu as pltpu


# ----------------------------------------------------------------------------
# small in-kernel math helpers
# ----------------------------------------------------------------------------
def _silu(x):
    return x * jax.nn.sigmoid(x)


def _softplus(x):
    # matches torch.nn.functional.softplus (beta=1, threshold=20)
    return jnp.where(x > 20.0, x, jnp.log1p(jnp.exp(x)))


# ----------------------------------------------------------------------------
# fused BiMamba_Block kernel: one grid step per batch element.
# Per batch element: fwd mamba (tiled over L), bwd mamba (structurally
# reversed, tiled over L), residual sum, fused post LayerNorm.
# ----------------------------------------------------------------------------
def bimamba_block_kernel(seq_tile, chunk_t,
                         x_ref, w_in_ref, w_conv_ref, b_conv_ref, w_xp_ref,
                         w_dt_ref, b_dt_ref, a_log_ref, dskip_ref, w_out_ref,
                         g_ref, beta_ref,
                         o_ref,
                         pad_s, xc_s, sz_s, ys_s, xp_s, acc_s):
    L, Dm = x_ref.shape[1], x_ref.shape[2]
    K, Di = w_conv_ref.shape[1], w_conv_ref.shape[2]
    N = a_log_ref.shape[1]
    LT = seq_tile                       # rows per sequence tile (multiple of T, 8)
    T = chunk_t                         # rows per scan chunk (multiple of 8)
    NT = L // LT
    NC = LT // T
    HALO = K - 1
    PADTOP = pad_s.shape[0] - LT        # sublane-aligned pad rows (multiple of 8)

    def run_direction(dr, reverse):
        # per-direction parameters (small, loaded once per direction)
        a_t = -jnp.exp(a_log_ref[dr])                 # (N, Di) f32
        wconv = w_conv_ref[dr]                        # (K, Di) f32
        conv_b = b_conv_ref[dr]                       # (1, Di) f32
        dt_b = b_dt_ref[dr]                           # (1, Di) f32
        d_skip = dskip_ref[dr]                        # (1, Di) f32
        w_in_d = w_in_ref[dr]                         # (Dm, 2Di) bf16
        w_xp_d = w_xp_ref[dr]                         # (Di, P)   bf16 (P>=128)
        w_dt_d = w_dt_ref[dr]                         # (P, Di)   bf16 (zero-extended)
        w_out_d = w_out_ref[dr]                       # (Di, Dm)  bf16

        def tile_body(t, carry):
            h, halo = carry
            base = (L - LT - t * LT) if reverse else (t * LT)
            base = pl.multiple_of(base, LT)

            # ---- fused in_proj: [x | z] (bf16 operands, f32 accumulation) ----
            x_tile = x_ref[0, pl.ds(base, LT), :]      # (LT, Dm) f32
            proj = jnp.dot(x_tile.astype(jnp.bfloat16), w_in_d,
                           preferred_element_type=jnp.float32)    # (LT, 2Di)
            xin = proj[:, :Di]
            sz_s[...] = _silu(proj[:, Di:])            # gate, used after the scan

            # ---- depthwise conv1d: causal (fwd) / anti-causal (bwd) ----------
            # big xin store is sublane-aligned; only the (K-1)-row halo store
            # is masked.  K static shifted-tap adds (VPU only, no MXU).
            if reverse:
                pad_s[pl.ds(0, LT), :] = xin
                pad_s[pl.ds(LT, PADTOP), :] = jnp.zeros((PADTOP, Di), jnp.float32)
                pad_s[pl.ds(LT, HALO), :] = halo       # first K-1 rows of right tile
                conv = conv_b
                for k in range(K):
                    conv = conv + pad_s[pl.ds(K - 1 - k, LT), :] * wconv[k:k + 1, :]
                new_halo = xin[:HALO, :]
            else:
                pad_s[pl.ds(0, PADTOP), :] = jnp.zeros((PADTOP, Di), jnp.float32)
                pad_s[pl.ds(PADTOP - HALO, HALO), :] = halo   # last K-1 rows of left tile
                pad_s[pl.ds(PADTOP, LT), :] = xin
                conv = conv_b
                for k in range(K):
                    conv = conv + pad_s[pl.ds(PADTOP - HALO + k, LT), :] * wconv[k:k + 1, :]
                new_halo = xin[LT - HALO:, :]
            xc = _silu(conv)                           # (LT, Di)
            xc_s[...] = xc

            # ---- lane-dense fused x_proj: [B | C | dt_low | 0...] -> (LT, P) --
            xp_s[...] = jnp.dot(xc.astype(jnp.bfloat16), w_xp_d,
                                preferred_element_type=jnp.float32)

            # ---- chunked selective scan (serial carry h only) ----------------
            def chunk_body(c, hc):
                lb = (LT - T - c * T) if reverse else (c * T)
                lb = pl.multiple_of(lb, T)
                xp_c = xp_s[pl.ds(lb, T), :]           # (T, P)
                x_c = xc_s[pl.ds(lb, T), :]            # (T, Di)
                b_t = xp_c[:, :N][:, :, None]          # (T, N, 1)
                c_t = xp_c[:, N:2 * N][:, :, None]     # (T, N, 1)
                # per-chunk delta on the (otherwise idle) MXU; w_dt rows for
                # the B/C/pad columns are zero so this equals dt_low @ w_dt.
                delta = _softplus(
                    jnp.dot(xp_c.astype(jnp.bfloat16), w_dt_d,
                            preferred_element_type=jnp.float32) + dt_b)   # (T, Di)
                dA = jnp.exp(delta[:, None, :] * a_t[None, :, :])         # (T, N, Di)
                du = delta * x_c                                          # (T, Di)
                ys = [None] * T
                order = range(T - 1, -1, -1) if reverse else range(T)
                for i in order:                        # static unroll, VPU carry
                    hc = dA[i] * hc + b_t[i] * du[i:i + 1, :]
                    ys[i] = jnp.sum(c_t[i] * hc, axis=0, keepdims=True)   # (1, Di)
                ys_s[pl.ds(lb, T), :] = jnp.concatenate(ys, axis=0)       # aligned
                return hc

            h = lax.fori_loop(0, NC, chunk_body, h)

            # ---- skip connection, gate, out_proj -----------------------------
            y = (ys_s[...] + d_skip * xc_s[...]) * sz_s[...]
            out_t = jnp.dot(y.astype(jnp.bfloat16), w_out_d,
                            preferred_element_type=jnp.float32)           # (LT, Dm)

            if reverse:
                # second direction: add to residual+fwd, fuse post LayerNorm.
                rows = acc_s[pl.ds(base, LT), :] + out_t
                mu = jnp.mean(rows, axis=-1, keepdims=True)
                cen = rows - mu
                var = jnp.mean(cen * cen, axis=-1, keepdims=True)
                o_ref[0, pl.ds(base, LT), :] = (
                    cen * lax.rsqrt(var + 1e-5) * g_ref[...] + beta_ref[...]
                ).astype(o_ref.dtype)
            else:
                # first direction: residual + forward mamba into the accumulator.
                acc_s[pl.ds(base, LT), :] = x_tile + out_t

            return (h, new_halo)

        lax.fori_loop(
            0, NT, tile_body,
            (jnp.zeros((N, Di), jnp.float32), jnp.zeros((HALO, Di), jnp.float32)))

    run_direction(0, reverse=False)
    run_direction(1, reverse=True)


# ----------------------------------------------------------------------------
# wrapper
# ----------------------------------------------------------------------------
def _pick_seq_tile(seq_len, chunk, max_tile):
    lt = max(chunk, min(max_tile, seq_len))
    lt -= lt % chunk
    while seq_len % lt:
        lt -= chunk
    return lt


def _vmem_limit_bytes():
    kind = ""
    try:
        kind = jax.devices()[0].device_kind.lower()
    except Exception:
        pass
    if "v7" in kind:
        return 48 * 1024 * 1024          # 64 MiB physical per core on v7x
    if "v4" in kind or "v5" in kind or "v6" in kind:
        return 100 * 1024 * 1024         # 128 MiB physical
    return 64 * 1024 * 1024


def bimamba_block_forward(x, params, chunk_t=8, max_seq_tile=256):
    B, L, D = x.shape
    assert chunk_t % 8 == 0, "scan chunk must be sublane-aligned (multiple of 8)"
    assert L % chunk_t == 0, "sequence length must be a multiple of the scan chunk"
    K, Di = params["w_conv"].shape[1], params["w_conv"].shape[2]
    N = params["A_logT"].shape[1]
    R = params["w_dt"].shape[1]
    # NOTE: best performance when D and Di are multiples of 128 (lane-dense).

    LT = _pick_seq_tile(L, chunk_t, max_seq_tile)
    pad_rows = max(8, ((K - 1 + 7) // 8) * 8)

    # lane-pad x_proj output to P (>=128): columns are [B | C | dt_low | 0...]
    P = max(128, ((2 * N + R + 127) // 128) * 128)
    w_x_pad = jnp.pad(params["w_x_all"].astype(jnp.bfloat16),
                      ((0, 0), (0, 0), (0, P - (2 * N + R))))
    # zero-extend dt_proj weight to (P, Di) so xp @ w_dt_ext == dt_low @ w_dt
    w_dt_ext = jnp.zeros((2, P, Di), jnp.bfloat16)
    w_dt_ext = w_dt_ext.at[:, 2 * N:2 * N + R, :].set(
        params["w_dt"].astype(jnp.bfloat16))

    weights = [params["w_in"].astype(jnp.bfloat16), params["w_conv"],
               params["b_conv"], w_x_pad, w_dt_ext, params["b_dt"],
               params["A_logT"], params["D"],
               params["w_out"].astype(jnp.bfloat16),
               params["ln_g"], params["ln_b"]]

    def wspec(w):
        nd = w.ndim
        return pl.BlockSpec(w.shape, lambda b, _nd=nd: (0,) * _nd)

    kernel = functools.partial(bimamba_block_kernel, LT, chunk_t)

    return pl.pallas_call(
        kernel,
        out_shape=jax.ShapeDtypeStruct((B, L, D), jnp.float32),
        grid=(B,),
        in_specs=[pl.BlockSpec((1, L, D), lambda b: (b, 0, 0))]
                 + [wspec(w) for w in weights],
        out_specs=pl.BlockSpec((1, L, D), lambda b: (b, 0, 0)),
        scratch_shapes=[
            pltpu.VMEM((LT + pad_rows, Di), jnp.float32),  # aligned conv pad buffer
            pltpu.VMEM((LT, Di), jnp.float32),             # xc (conv output, SiLU'd)
            pltpu.VMEM((LT, Di), jnp.float32),             # silu(z) gate
            pltpu.VMEM((LT, Di), jnp.float32),             # scan outputs (per tile)
            pltpu.VMEM((LT, P), jnp.float32),              # lane-dense x_proj out
            pltpu.VMEM((L, D), jnp.float32),               # residual + fwd accum
        ],
        compiler_params=pltpu.CompilerParams(
            dimension_semantics=("parallel",),             # v7x megacore over batch
            vmem_limit_bytes=_vmem_limit_bytes()),
    )(x, *weights)


# ----------------------------------------------------------------------------
# deterministic parameter init (shapes follow mamba-ssm defaults); direction is
# the leading axis of size 2 (0 = forward, 1 = backward).
# ----------------------------------------------------------------------------
def init_params(key, dim, d_state=16, d_conv=4, expand=2):
    d_inner = expand * dim
    dt_rank = math.ceil(dim / 16)
    ks = jax.random.split(key, 8)

    def rnd(k, shape, scale=0.1):
        return scale * jax.random.normal(k, shape, jnp.float32)

    # S4D-real A init (same values for both directions), stored transposed (N, Di)
    a_logT = (jnp.log(jnp.arange(1, d_state + 1, dtype=jnp.float32))[None, :, None]
              * jnp.ones((2, 1, d_inner), jnp.float32))

    bf = jnp.bfloat16
    return dict(
        # fused in_proj producing [x | z]
        w_in=rnd(ks[0], (2, dim, 2 * d_inner)).astype(bf),
        w_conv=rnd(ks[1], (2, d_conv, d_inner), 0.3),
        b_conv=rnd(ks[2], (2, 1, d_inner), 0.05),
        # fused x_proj: [B | C | dt_low]
        w_x_all=rnd(ks[3], (2, d_inner, 2 * d_state + dt_rank)).astype(bf),
        w_dt=rnd(ks[4], (2, dt_rank, d_inner), 0.3).astype(bf),
        b_dt=(jnp.full((2, 1, d_inner), -2.0, jnp.float32)
              + rnd(ks[5], (2, 1, d_inner), 0.05)),
        A_logT=a_logT,
        D=jnp.ones((2, 1, d_inner), jnp.float32),
        w_out=rnd(ks[6], (2, d_inner, dim)).astype(bf),
        ln_g=jnp.ones((1, dim), jnp.float32),       # post_norm weight
        ln_b=jnp.zeros((1, dim), jnp.float32),      # post_norm bias
    )


if __name__ == "__main__":
    key = jax.random.PRNGKey(0)
    kx, kp = jax.random.split(key)
    B, L, D = 2, 8, 32          # batch, sequence, d_model
    x = jax.random.normal(kx, (B, L, D), jnp.float32)
    params = init_params(kp, D)

    fwd = jax.jit(bimamba_block_forward)
    y = fwd(x, params)
    jax.block_until_ready(y)
    assert y.shape == (B, L, D) and y.dtype == jnp.float32
    assert bool(jnp.all(jnp.isfinite(y)))
    print("KERNEL_OK")
</pallas_src>

<mosaic_0001>
module attributes {stable_mosaic.version = 11 : i64} {
  func.func @bimamba_block_kernel(%arg0: i32, %arg1: memref<1x8x32xf32, #tpu.memory_space<vmem>>, %arg2: memref<2x32x128xbf16, #tpu.memory_space<vmem>>, %arg3: memref<2x4x64xf32, #tpu.memory_space<vmem>>, %arg4: memref<2x1x64xf32, #tpu.memory_space<vmem>>, %arg5: memref<2x64x128xbf16, #tpu.memory_space<vmem>>, %arg6: memref<2x128x64xbf16, #tpu.memory_space<vmem>>, %arg7: memref<2x1x64xf32, #tpu.memory_space<vmem>>, %arg8: memref<2x16x64xf32, #tpu.memory_space<vmem>>, %arg9: memref<2x1x64xf32, #tpu.memory_space<vmem>>, %arg10: memref<2x64x32xbf16, #tpu.memory_space<vmem>>, %arg11: memref<1x32xf32, #tpu.memory_space<vmem>>, %arg12: memref<1x32xf32, #tpu.memory_space<vmem>>, %arg13: memref<1x8x32xf32, #tpu.memory_space<vmem>>, %arg14: memref<16x64xf32, #tpu.memory_space<vmem>>, %arg15: memref<8x64xf32, #tpu.memory_space<vmem>>, %arg16: memref<8x64xf32, #tpu.memory_space<vmem>>, %arg17: memref<8x64xf32, #tpu.memory_space<vmem>>, %arg18: memref<8x128xf32, #tpu.memory_space<vmem>>, %arg19: memref<8x32xf32, #tpu.memory_space<vmem>>) attributes {dimension_semantics = [#tpu.dimension_semantics<parallel>], iteration_bounds = array<i64: 2>, scalar_prefetch = 0 : i64, scratch_operands = 6 : i64, tpu.core_type = #tpu.core_type<tc>, window_params = [{transform_indices = @transform_0, window_bounds = array<i64: 1, 8, 32>}, {pipeline_mode = #tpu.pipeline_mode<synchronous>, transform_indices = @transform_1, window_bounds = array<i64: 2, 32, 128>}, {pipeline_mode = #tpu.pipeline_mode<synchronous>, transform_indices = @transform_2, window_bounds = array<i64: 2, 4, 64>}, {pipeline_mode = #tpu.pipeline_mode<synchronous>, transform_indices = @transform_3, window_bounds = array<i64: 2, 1, 64>}, {pipeline_mode = #tpu.pipeline_mode<synchronous>, transform_indices = @transform_4, window_bounds = array<i64: 2, 64, 128>}, {pipeline_mode = #tpu.pipeline_mode<synchronous>, transform_indices = @transform_5, window_bounds = array<i64: 2, 128, 64>}, {pipeline_mode = #tpu.pipeline_mode<synchronous>, transform_indices = @transform_6, window_bounds = array<i64: 2, 1, 64>}, {pipeline_mode = #tpu.pipeline_mode<synchronous>, transform_indices = @transform_7, window_bounds = array<i64: 2, 16, 64>}, {pipeline_mode = #tpu.pipeline_mode<synchronous>, transform_indices = @transform_8, window_bounds = array<i64: 2, 1, 64>}, {pipeline_mode = #tpu.pipeline_mode<synchronous>, transform_indices = @transform_9, window_bounds = array<i64: 2, 64, 32>}, {pipeline_mode = #tpu.pipeline_mode<synchronous>, transform_indices = @transform_10, window_bounds = array<i64: 1, 32>}, {pipeline_mode = #tpu.pipeline_mode<synchronous>, transform_indices = @transform_11, window_bounds = array<i64: 1, 32>}, {transform_indices = @transform_12, window_bounds = array<i64: 1, 8, 32>}]} {
    %c0 = arith.constant 0 : index
    %c0_0 = arith.constant 0 : index
    %c0_1 = arith.constant 0 : index
    %0 = vector.load %arg8[%c0, %c0_0, %c0_1] : memref<2x16x64xf32, #tpu.memory_space<vmem>>, vector<1x16x64xf32>
    %1 = vector.shape_cast %0 : vector<1x16x64xf32> to vector<16x64xf32>
    %2 = math.exp %1 : vector<16x64xf32>
    %cst = arith.constant 0.000000e+00 : f32
    %3 = vector.broadcast %cst : f32 to vector<16x64xf32>
    %4 = arith.subf %3, %2 : vector<16x64xf32>
    %c0_2 = arith.constant 0 : index
    %c0_3 = arith.constant 0 : index
    %c0_4 = arith.constant 0 : index
    %5 = vector.load %arg3[%c0_2, %c0_3, %c0_4] : memref<2x4x64xf32, #tpu.memory_space<vmem>>, vector<1x4x64xf32>
    %6 = vector.shape_cast %5 : vector<1x4x64xf32> to vector<4x64xf32>
    %c0_5 = arith.constant 0 : index
    %c0_6 = arith.constant 0 : index
    %c0_7 = arith.constant 0 : index
    %7 = vector.load %arg4[%c0_5, %c0_6, %c0_7] : memref<2x1x64xf32, #tpu.memory_space<vmem>>, vector<1x1x64xf32>
    %8 = vector.shape_cast %7 : vector<1x1x64xf32> to vector<1x64xf32>
    %c0_8 = arith.constant 0 : index
    %c0_9 = arith.constant 0 : index
    %c0_10 = arith.constant 0 : index
    %9 = vector.load %arg7[%c0_8, %c0_9, %c0_10] : memref<2x1x64xf32, #tpu.memory_space<vmem>>, vector<1x1x64xf32>
    %10 = vector.shape_cast %9 : vector<1x1x64xf32> to vector<1x64xf32>
    %c0_11 = arith.constant 0 : index
    %c0_12 = arith.constant 0 : index
    %c0_13 = arith.constant 0 : index
    %11 = vector.load %arg9[%c0_11, %c0_12, %c0_13] : memref<2x1x64xf32, #tpu.memory_space<vmem>>, vector<1x1x64xf32>
    %12 = vector.shape_cast %11 : vector<1x1x64xf32> to vector<1x64xf32>
    %c0_14 = arith.constant 0 : index
    %c0_15 = arith.constant 0 : index
    %c0_16 = arith.constant 0 : index
    %13 = vector.load %arg2[%c0_14, %c0_15, %c0_16] : memref<2x32x128xbf16, #tpu.memory_space<vmem>>, vector<1x32x128xbf16>
    %14 = vector.shape_cast %13 : vector<1x32x128xbf16> to vector<32x128xbf16>
    %c0_17 = arith.constant 0 : index
    %c0_18 = arith.constant 0 : index
    %c0_19 = arith.constant 0 : index
    %15 = vector.load %arg5[%c0_17, %c0_18, %c0_19] : memref<2x64x128xbf16, #tpu.memory_space<vmem>>, vector<1x64x128xbf16>
    %16 = vector.shape_cast %15 : vector<1x64x128xbf16> to vector<64x128xbf16>
    %c0_20 = arith.constant 0 : index
    %c0_21 = arith.constant 0 : index
    %c0_22 = arith.constant 0 : index
    %17 = vector.load %arg6[%c0_20, %c0_21, %c0_22] : memref<2x128x64xbf16, #tpu.memory_space<vmem>>, vector<1x128x64xbf16>
    %18 = vector.shape_cast %17 : vector<1x128x64xbf16> to vector<128x64xbf16>
    %c0_23 = arith.constant 0 : index
    %c0_24 = arith.constant 0 : index
    %c0_25 = arith.constant 0 : index
    %19 = vector.load %arg10[%c0_23, %c0_24, %c0_25] : memref<2x64x32xbf16, #tpu.memory_space<vmem>>, vector<1x64x32xbf16>
    %20 = vector.shape_cast %19 : vector<1x64x32xbf16> to vector<64x32xbf16>
    %cst_26 = arith.constant 0.000000e+00 : f32
    %21 = vector.broadcast %cst_26 : f32 to vector<16x64xf32>
    %cst_27 = arith.constant 0.000000e+00 : f32
    %22 = vector.broadcast %cst_27 : f32 to vector<3x64xf32>
    %c0_i32 = arith.constant 0 : i32
    %c8_i32 = arith.constant 8 : i32
    %23 = arith.muli %c0_i32, %c8_i32 : i32
    %24 = tpu.assume_multiple %23, 8 : i32
    %c0_28 = arith.constant 0 : index
    %25 = arith.index_cast %24 : i32 to index
    %c0_29 = arith.constant 0 : index
    %26 = vector.load %arg1[%c0_28, %25, %c0_29] : memref<1x8x32xf32, #tpu.memory_space<vmem>>, vector<1x8x32xf32>
    %27 = vector.shape_cast %26 : vector<1x8x32xf32> to vector<8x32xf32>
    %28 = arith.truncf %27 : vector<8x32xf32> to vector<8x32xbf16>
    %cst_30 = arith.constant dense<0.000000e+00> : vector<8x128xf32>
    %29 = tpu.matmul %28, %14, %cst_30 {dimension_numbers = #tpu.dot_dimension_numbers<[1], [0], [0], [1], [0, 0, 1, 1], [], []>} : vector<8x32xbf16>, vector<32x128xbf16>, vector<8x128xf32> -> vector<8x128xf32>
    %30 = vector.extract_strided_slice %29 {offsets = [0, 0], sizes = [8, 64], strides = [1, 1]} : vector<8x128xf32> to vector<8x64xf32>
    %31 = vector.extract_strided_slice %29 {offsets = [0, 64], sizes = [8, 64], strides = [1, 1]} : vector<8x128xf32> to vector<8x64xf32>
    %32 = arith.negf %31 : vector<8x64xf32>
    %33 = math.exp %32 : vector<8x64xf32>
    %cst_31 = arith.constant 1.000000e+00 : f32
    %34 = vector.broadcast %cst_31 : f32 to vector<8x64xf32>
    %35 = arith.addf %34, %33 : vector<8x64xf32>
    %36 = arith.divf %34, %35 : vector<8x64xf32>
    %37 = arith.mulf %31, %36 : vector<8x64xf32>
    %c0_32 = arith.constant 0 : index
    %c0_33 = arith.constant 0 : index
    %38 = vector.load %arg16[%c0_32, %c0_33] : memref<8x64xf32, #tpu.memory_space<vmem>>, vector<8x64xf32>
    tpu.vector_store %arg16[%c0_32, %c0_33], %37 {strides = array<i32>} : memref<8x64xf32, #tpu.memory_space<vmem>>, vector<8x64xf32>,
    %cst_34 = arith.constant 0.000000e+00 : f32
    %39 = vector.broadcast %cst_34 : f32 to vector<8x64xf32>
    %c0_35 = arith.constant 0 : index
    %c0_36 = arith.constant 0 : index
    %40 = vector.load %arg14[%c0_35, %c0_36] : memref<16x64xf32, #tpu.memory_space<vmem>>, vector<8x64xf32>
    tpu.vector_store %arg14[%c0_35, %c0_36], %39 {strides = array<i32>} : memref<16x64xf32, #tpu.memory_space<vmem>>, vector<8x64xf32>,
    %c5 = arith.constant 5 : index
    %c0_37 = arith.constant 0 : index
    %41 = vector.load %arg14[%c5, %c0_37] : memref<16x64xf32, #tpu.memory_space<vmem>>, vector<3x64xf32>
    tpu.vector_store %arg14[%c5, %c0_37], %22 {strides = array<i32>} : memref<16x64xf32, #tpu.memory_space<vmem>>, vector<3x64xf32>,
    %c8 = arith.constant 8 : index
    %c0_38 = arith.constant 0 : index
    %42 = vector.load %arg14[%c8, %c0_38] : memref<16x64xf32, #tpu.memory_space<vmem>>, vector<8x64xf32>
    tpu.vector_store %arg14[%c8, %c0_38], %30 {strides = array<i32>} : memref<16x64xf32, #tpu.memory_space<vmem>>, vector<8x64xf32>,
    %c5_39 = arith.constant 5 : index
    %c0_40 = arith.constant 0 : index
    %43 = vector.load %arg14[%c5_39, %c0_40] : memref<16x64xf32, #tpu.memory_space<vmem>>, vector<8x64xf32>
    %44 = vector.extract_strided_slice %6 {offsets = [0, 0], sizes = [1, 64], strides = [1, 1]} : vector<4x64xf32> to vector<1x64xf32>
    %45 = vector.broadcast %44 : vector<1x64xf32> to vector<8x64xf32>
    %46 = arith.mulf %43, %45 : vector<8x64xf32>
    %47 = vector.broadcast %8 : vector<1x64xf32> to vector<8x64xf32>
    %48 = arith.addf %47, %46 : vector<8x64xf32>
    %c6 = arith.constant 6 : index
    %c0_41 = arith.constant 0 : index
    %49 = vector.load %arg14[%c6, %c0_41] : memref<16x64xf32, #tpu.memory_space<vmem>>, vector<8x64xf32>
    %50 = vector.extract_strided_slice %6 {offsets = [1, 0], sizes = [1, 64], strides = [1, 1]} : vector<4x64xf32> to vector<1x64xf32>
    %51 = vector.broadcast %50 : vector<1x64xf32> to vector<8x64xf32>
    %52 = arith.mulf %49, %51 : vector<8x64xf32>
    %53 = arith.addf %48, %52 : vector<8x64xf32>
    %c7 = arith.constant 7 : index
    %c0_42 = arith.constant 0 : index
    %54 = vector.load %arg14[%c7, %c0_42] : memref<16x64xf32, #tpu.memory_space<vmem>>, vector<8x64xf32>
    %55 = vector.extract_strided_slice %6 {offsets = [2, 0], sizes = [1, 64], strides = [1, 1]} : vector<4x64xf32> to vector<1x64xf32>
    %56 = vector.broadcast %55 : vector<1x64xf32> to vector<8x64xf32>
    %57 = arith.mulf %54, %56 : vector<8x64xf32>
    %58 = arith.addf %53, %57 : vector<8x64xf32>
    %c8_43 = arith.constant 8 : index
    %c0_44 = arith.constant 0 : index
    %59 = vector.load %arg14[%c8_43, %c0_44] : memref<16x64xf32, #tpu.memory_space<vmem>>, vector<8x64xf32>
    %60 = vector.extract_strided_slice %6 {offsets = [3, 0], sizes = [1, 64], strides = [1, 1]} : vector<4x64xf32> to vector<1x64xf32>
    %61 = vector.broadcast %60 : vector<1x64xf32> to vector<8x64xf32>
    %62 = arith.mulf %59, %61 : vector<8x64xf32>
    %63 = arith.addf %58, %62 : vector<8x64xf32>
    %64 = vector.extract_strided_slice %30 {offsets = [5, 0], sizes = [3, 64], strides = [1, 1]} : vector<8x64xf32> to vector<3x64xf32>
    %65 = arith.negf %63 : vector<8x64xf32>
    %66 = math.exp %65 : vector<8x64xf32>
    %cst_45 = arith.constant 1.000000e+00 : f32
    %67 = vector.broadcast %cst_45 : f32 to vector<8x64xf32>
    %68 = arith.addf %67, %66 : vector<8x64xf32>
    %69 = arith.divf %67, %68 : vector<8x64xf32>
    %70 = arith.mulf %63, %69 : vector<8x64xf32>
    %c0_46 = arith.constant 0 : index
    %c0_47 = arith.constant 0 : index
    %71 = vector.load %arg15[%c0_46, %c0_47] : memref<8x64xf32, #tpu.memory_space<vmem>>, vector<8x64xf32>
    tpu.vector_store %arg15[%c0_46, %c0_47], %70 {strides = array<i32>} : memref<8x64xf32, #tpu.memory_space<vmem>>, vector<8x64xf32>,
    %72 = arith.truncf %70 : vector<8x64xf32> to vector<8x64xbf16>
    %cst_48 = arith.constant dense<0.000000e+00> : vector<8x128xf32>
    %73 = tpu.matmul %72, %16, %cst_48 {dimension_numbers = #tpu.dot_dimension_numbers<[1], [0], [0], [1], [0, 0, 1, 1], [], []>} : vector<8x64xbf16>, vector<64x128xbf16>, vector<8x128xf32> -> vector<8x128xf32>
    %c0_49 = arith.constant 0 : index
    %c0_50 = arith.constant 0 : index
    %74 = vector.load %arg18[%c0_49, %c0_50] : memref<8x128xf32, #tpu.memory_space<vmem>>, vector<8x128xf32>
    tpu.vector_store %arg18[%c0_49, %c0_50], %73 {strides = array<i32>} : memref<8x128xf32, #tpu.memory_space<vmem>>, vector<8x128xf32>,
    %c0_i32_51 = arith.constant 0 : i32
    %c8_i32_52 = arith.constant 8 : i32
    %75 = arith.muli %c0_i32_51, %c8_i32_52 : i32
    %76 = tpu.assume_multiple %75, 8 : i32
    %77 = arith.index_cast %76 : i32 to index
    %c0_53 = arith.constant 0 : index
    %78 = vector.load %arg18[%77, %c0_53] : memref<8x128xf32, #tpu.memory_space<vmem>>, vector<8x128xf32>
    %79 = arith.index_cast %76 : i32 to index
    %c0_54 = arith.constant 0 : index
    %80 = vector.load %arg15[%79, %c0_54] : memref<8x64xf32, #tpu.memory_space<vmem>>, vector<8x64xf32>
    %81 = vector.extract_strided_slice %78 {offsets = [0, 0], sizes = [8, 16], strides = [1, 1]} : vector<8x128xf32> to vector<8x16xf32>
    %82 = vector.shape_cast %81 : vector<8x16xf32> to vector<8x16x1xf32>
    %83 = vector.extract_strided_slice %78 {offsets = [0, 16], sizes = [8, 16], strides = [1, 1]} : vector<8x128xf32> to vector<8x16xf32>
    %84 = vector.shape_cast %83 : vector<8x16xf32> to vector<8x16x1xf32>
    %85 = arith.truncf %78 : vector<8x128xf32> to vector<8x128xbf16>
    %cst_55 = arith.constant dense<0.000000e+00> : vector<8x64xf32>
    %86 = tpu.matmul %85, %18, %cst_55 {dimension_numbers = #tpu.dot_dimension_numbers<[1], [0], [0], [1], [0, 0, 1, 1], [], []>} : vector<8x128xbf16>, vector<128x64xbf16>, vector<8x64xf32> -> vector<8x64xf32>
    %87 = vector.broadcast %10 : vector<1x64xf32> to vector<8x64xf32>
    %88 = arith.addf %86, %87 : vector<8x64xf32>
    %cst_56 = arith.constant 2.000000e+01 : f32
    %89 = vector.broadcast %cst_56 : f32 to vector<8x64xf32>
    %90 = arith.cmpf ogt, %88, %89 : vector<8x64xf32>
    %91 = math.exp %88 : vector<8x64xf32>
    %92 = math.log1p %91 : vector<8x64xf32>
    %93 = arith.select %90, %88, %92 : vector<8x64xi1>, vector<8x64xf32>
    %94 = vector.shape_cast %93 : vector<8x64xf32> to vector<8x1x64xf32>
    %95 = vector.shape_cast %4 : vector<16x64xf32> to vector<1x16x64xf32>
    %96 = vector.broadcast %94 : vector<8x1x64xf32> to vector<8x16x64xf32>
    %97 = vector.broadcast %95 : vector<1x16x64xf32> to vector<8x16x64xf32>
    %98 = arith.mulf %96, %97 : vector<8x16x64xf32>
    %99 = math.exp %98 : vector<8x16x64xf32>
    %100 = arith.mulf %93, %80 : vector<8x64xf32>
    %101 = vector.extract_strided_slice %99 {offsets = [0, 0, 0], sizes = [1, 16, 64], strides = [1, 1, 1]} : vector<8x16x64xf32> to vector<1x16x64xf32>
    %102 = vector.shape_cast %101 : vector<1x16x64xf32> to vector<16x64xf32>
    %103 = arith.mulf %102, %21 : vector<16x64xf32>
    %104 = vector.extract_strided_slice %82 {offsets = [0, 0, 0], sizes = [1, 16, 1], strides = [1, 1, 1]} : vector<8x16x1xf32> to vector<1x16x1xf32>
    %105 = vector.shape_cast %104 : vector<1x16x1xf32> to vector<16x1xf32>
    %106 = vector.extract_strided_slice %100 {offsets = [0, 0], sizes = [1, 64], strides = [1, 1]} : vector<8x64xf32> to vector<1x64xf32>
    %107 = vector.broadcast %105 : vector<16x1xf32> to vector<16x64xf32>
    %108 = vector.broadcast %106 : vector<1x64xf32> to vector<16x64xf32>
    %109 = arith.mulf %107, %108 : vector<16x64xf32>
    %110 = arith.addf %103, %109 : vector<16x64xf32>
    %111 = vector.extract_strided_slice %84 {offsets = [0, 0, 0], sizes = [1, 16, 1], strides = [1, 1, 1]} : vector<8x16x1xf32> to vector<1x16x1xf32>
    %112 = vector.shape_cast %111 : vector<1x16x1xf32> to vector<16x1xf32>
    %113 = vector.broadcast %112 : vector<16x1xf32> to vector<16x64xf32>
    %114 = arith.mulf %113, %110 : vector<16x64xf32>
    %cst_57 = arith.constant dense<0.000000e+00> : vector<64xf32>
    %115 = vector.multi_reduction <add>, %114, %cst_57 [0] : vector<16x64xf32> to vector<64xf32>
    %116 = vector.shape_cast %115 : vector<64xf32> to vector<1x64xf32>
    %117 = vector.extract_strided_slice %99 {offsets = [1, 0, 0], sizes = [1, 16, 64], strides = [1, 1, 1]} : vector<8x16x64xf32> to vector<1x16x64xf32>
    %118 = vector.shape_cast %117 : vector<1x16x64xf32> to vector<16x64xf32>
    %119 = arith.mulf %118, %110 : vector<16x64xf32>
    %120 = vector.extract_strided_slice %82 {offsets = [1, 0, 0], sizes = [1, 16, 1], strides = [1, 1, 1]} : vector<8x16x1xf32> to vector<1x16x1xf32>
    %121 = vector.shape_cast %120 : vector<1x16x1xf32> to vector<16x1xf32>
    %122 = vector.extract_strided_slice %100 {offsets = [1, 0], sizes = [1, 64], strides = [1, 1]} : vector<8x64xf32> to vector<1x64xf32>
    %123 = vector.broadcast %121 : vector<16x1xf32> to vector<16x64xf32>
    %124 = vector.broadcast %122 : vector<1x64xf32> to vector<16x64xf32>
    %125 = arith.mulf %123, %124 : vector<16x64xf32>
    %126 = arith.addf %119, %125 : vector<16x64xf32>
    %127 = vector.extract_strided_slice %84 {offsets = [1, 0, 0], sizes = [1, 16, 1], strides = [1, 1, 1]} : vector<8x16x1xf32> to vector<1x16x1xf32>
    %128 = vector.shape_cast %127 : vector<1x16x1xf32> to vector<16x1xf32>
    %129 = vector.broadcast %128 : vector<16x1xf32> to vector<16x64xf32>
    %130 = arith.mulf %129, %126 : vector<16x64xf32>
    %cst_58 = arith.constant dense<0.000000e+00> : vector<64xf32>
    %131 = vector.multi_reduction <add>, %130, %cst_58 [0] : vector<16x64xf32> to vector<64xf32>
    %132 = vector.shape_cast %131 : vector<64xf32> to vector<1x64xf32>
    %133 = vector.extract_strided_slice %99 {offsets = [2, 0, 0], sizes = [1, 16, 64], strides = [1, 1, 1]} : vector<8x16x64xf32> to vector<1x16x64xf32>
    %134 = vector.shape_cast %133 : vector<1x16x64xf32> to vector<16x64xf32>
    %135 = arith.mulf %134, %126 : vector<16x64xf32>
    %136 = vector.extract_strided_slice %82 {offsets = [2, 0, 0], sizes = [1, 16, 1], strides = [1, 1, 1]} : vector<8x16x1xf32> to vector<1x16x1xf32>
    %137 = vector.shape_cast %136 : vector<1x16x1xf32> to vector<16x1xf32>
    %138 = vector.extract_strided_slice %100 {offsets = [2, 0], sizes = [1, 64], strides = [1, 1]} : vector<8x64xf32> to vector<1x64xf32>
    %139 = vector.broadcast %137 : vector<16x1xf32> to vector<16x64xf32>
    %140 = vector.broadcast %138 : vector<1x64xf32> to vector<16x64xf32>
    %141 = arith.mulf %139, %140 : vector<16x64xf32>
    %142 = arith.addf %135, %141 : vector<16x64xf32>
    %143 = vector.extract_strided_slice %84 {offsets = [2, 0, 0], sizes = [1, 16, 1], strides = [1, 1, 1]} : vector<8x16x1xf32> to vector<1x16x1xf32>
    %144 = vector.shape_cast %143 : vector<1x16x1xf32> to vector<16x1xf32>
    %145 = vector.broadcast %144 : vector<16x1xf32> to vector<16x64xf32>
    %146 = arith.mulf %145, %142 : vector<16x64xf32>
    %cst_59 = arith.constant dense<0.000000e+00> : vector<64xf32>
    %147 = vector.multi_reduction <add>, %146, %cst_59 [0] : vector<16x64xf32> to vector<64xf32>
    %148 = vector.shape_cast %147 : vector<64xf32> to vector<1x64xf32>
    %149 = vector.extract_strided_slice %99 {offsets = [3, 0, 0], sizes = [1, 16, 64], strides = [1, 1, 1]} : vector<8x16x64xf32> to vector<1x16x64xf32>
    %150 = vector.shape_cast %149 : vector<1x16x64xf32> to vector<16x64xf32>
    %151 = arith.mulf %150, %142 : vector<16x64xf32>
    %152 = vector.extract_strided_slice %82 {offsets = [3, 0, 0], sizes = [1, 16, 1], strides = [1, 1, 1]} : vector<8x16x1xf32> to vector<1x16x1xf32>
    %153 = vector.shape_cast %152 : vector<1x16x1xf32> to vector<16x1xf32>
    %154 = vector.extract_strided_slice %100 {offsets = [3, 0], sizes = [1, 64], strides = [1, 1]} : vector<8x64xf32> to vector<1x64xf32>
    %155 = vector.broadcast %153 : vector<16x1xf32> to vector<16x64xf32>
    %156 = vector.broadcast %154 : vector<1x64xf32> to vector<16x64xf32>
    %157 = arith.mulf %155, %156 : vector<16x64xf32>
    %158 = arith.addf %151, %157 : vector<16x64xf32>
    %159 = vector.extract_strided_slice %84 {offsets = [3, 0, 0], sizes = [1, 16, 1], strides = [1, 1, 1]} : vector<8x16x1xf32> to vector<1x16x1xf32>
    %160 = vector.shape_cast %159 : vector<1x16x1xf32> to vector<16x1xf32>
    %161 = vector.broadcast %160 : vector<16x1xf32> to vector<16x64xf32>
    %162 = arith.mulf %161, %158 : vector<16x64xf32>
    %cst_60 = arith.constant dense<0.000000e+00> : vector<64xf32>
    %163 = vector.multi_reduction <add>, %162, %cst_60 [0] : vector<16x64xf32> to vector<64xf32>
    %164 = vector.shape_cast %163 : vector<64xf32> to vector<1x64xf32>
    %165 = vector.extract_strided_slice %99 {offsets = [4, 0, 0], sizes = [1, 16, 64], strides = [1, 1, 1]} : vector<8x16x64xf32> to vector<1x16x64xf32>
    %166 = vector.shape_cast %165 : vector<1x16x64xf32> to vector<16x64xf32>
    %167 = arith.mulf %166, %158 : vector<16x64xf32>
    %168 = vector.extract_strided_slice %82 {offsets = [4, 0, 0], sizes = [1, 16, 1], strides = [1, 1, 1]} : vector<8x16x1xf32> to vector<1x16x1xf32>
    %169 = vector.shape_cast %168 : vector<1x16x1xf32> to vector<16x1xf32>
    %170 = vector.extract_strided_slice %100 {offsets = [4, 0], sizes = [1, 64], strides = [1, 1]} : vector<8x64xf32> to vector<1x64xf32>
    %171 = vector.broadcast %169 : vector<16x1xf32> to vector<16x64xf32>
    %172 = vector.broadcast %170 : vector<1x64xf32> to vector<16x64xf32>
    %173 = arith.mulf %171, %172 : vector<16x64xf32>
    %174 = arith.addf %167, %173 : vector<16x64xf32>
    %175 = vector.extract_strided_slice %84 {offsets = [4, 0, 0], sizes = [1, 16, 1], strides = [1, 1, 1]} : vector<8x16x1xf32> to vector<1x16x1xf32>
    %176 = vector.shape_cast %175 : vector<1x16x1xf32> to vector<16x1xf32>
    %177 = vector.broadcast %176 : vector<16x1xf32> to vector<16x64xf32>
    %178 = arith.mulf %177, %174 : vector<16x64xf32>
    %cst_61 = arith.constant dense<0.000000e+00> : vector<64xf32>
    %179 = vector.multi_reduction <add>, %178, %cst_61 [0] : vector<16x64xf32> to vector<64xf32>
    %180 = vector.shape_cast %179 : vector<64xf32> to vector<1x64xf32>
    %181 = vector.extract_strided_slice %99 {offsets = [5, 0, 0], sizes = [1, 16, 64], strides = [1, 1, 1]} : vector<8x16x64xf32> to vector<1x16x64xf32>
    %182 = vector.shape_cast %181 : vector<1x16x64xf32> to vector<16x64xf32>
    %183 = arith.mulf %182, %174 : vector<16x64xf32>
    %184 = vector.extract_strided_slice %82 {offsets = [5, 0, 0], sizes = [1, 16, 1], strides = [1, 1, 1]} : vector<8x16x1xf32> to vector<1x16x1xf32>
    %185 = vector.shape_cast %184 : vector<1x16x1xf32> to vector<16x1xf32>
    %186 = vector.extract_strided_slice %100 {offsets = [5, 0], sizes = [1, 64], strides = [1, 1]} : vector<8x64xf32> to vector<1x64xf32>
    %187 = vector.broadcast %185 : vector<16x1xf32> to vector<16x64xf32>
    %188 = vector.broadcast %186 : vector<1x64xf32> to vector<16x64xf32>
    %189 = arith.mulf %187, %188 : vector<16x64xf32>
    %190 = arith.addf %183, %189 : vector<16x64xf32>
    %191 = vector.extract_strided_slice %84 {offsets = [5, 0, 0], sizes = [1, 16, 1], strides = [1, 1, 1]} : vector<8x16x1xf32> to vector<1x16x1xf32>
    %192 = vector.shape_cast %191 : vector<1x16x1xf32> to vector<16x1xf32>
    %193 = vector.broadcast %192 : vector<16x1xf32> to vector<16x64xf32>
    %194 = arith.mulf %193, %190 : vector<16x64xf32>
    %cst_62 = arith.constant dense<0.000000e+00> : vector<64xf32>
    %195 = vector.multi_reduction <add>, %194, %cst_62 [0] : vector<16x64xf32> to vector<64xf32>
    %196 = vector.shape_cast %195 : vector<64xf32> to vector<1x64xf32>
    %197 = vector.extract_strided_slice %99 {offsets = [6, 0, 0], sizes = [1, 16, 64], strides = [1, 1, 1]} : vector<8x16x64xf32> to vector<1x16x64xf32>
    %198 = vector.shape_cast %197 : vector<1x16x64xf32> to vector<16x64xf32>
    %199 = arith.mulf %198, %190 : vector<16x64xf32>
    %200 = vector.extract_strided_slice %82 {offsets = [6, 0, 0], sizes = [1, 16, 1], strides = [1, 1, 1]} : vector<8x16x1xf32> to vector<1x16x1xf32>
    %201 = vector.shape_cast %200 : vector<1x16x1xf32> to vector<16x1xf32>
    %202 = vector.extract_strided_slice %100 {offsets = [6, 0], sizes = [1, 64], strides = [1, 1]} : vector<8x64xf32> to vector<1x64xf32>
    %203 = vector.broadcast %201 : vector<16x1xf32> to vector<16x64xf32>
    %204 = vector.broadcast %202 : vector<1x64xf32> to vector<16x64xf32>
    %205 = arith.mulf %203, %204 : vector<16x64xf32>
    %206 = arith.addf %199, %205 : vector<16x64xf32>
    %207 = vector.extract_strided_slice %84 {offsets = [6, 0, 0], sizes = [1, 16, 1], strides = [1, 1, 1]} : vector<8x16x1xf32> to vector<1x16x1xf32>
    %208 = vector.shape_cast %207 : vector<1x16x1xf32> to vector<16x1xf32>
    %209 = vector.broadcast %208 : vector<16x1xf32> to vector<16x64xf32>
    %210 = arith.mulf %209, %206 : vector<16x64xf32>
    %cst_63 = arith.constant dense<0.000000e+00> : vector<64xf32>
    %211 = vector.multi_reduction <add>, %210, %cst_63 [0] : vector<16x64xf32> to vector<64xf32>
    %212 = vector.shape_cast %211 : vector<64xf32> to vector<1x64xf32>
    %213 = vector.extract_strided_slice %99 {offsets = [7, 0, 0], sizes = [1, 16, 64], strides = [1, 1, 1]} : vector<8x16x64xf32> to vector<1x16x64xf32>
    %214 = vector.shape_cast %213 : vector<1x16x64xf32> to vector<16x64xf32>
    %215 = arith.mulf %214, %206 : vector<16x64xf32>
    %216 = vector.extract_strided_slice %82 {offsets = [7, 0, 0], sizes = [1, 16, 1], strides = [1, 1, 1]} : vector<8x16x1xf32> to vector<1x16x1xf32>
    %217 = vector.shape_cast %216 : vector<1x16x1xf32> to vector<16x1xf32>
    %218 = vector.extract_strided_slice %100 {offsets = [7, 0], sizes = [1, 64], strides = [1, 1]} : vector<8x64xf32> to vector<1x64xf32>
    %219 = vector.broadcast %217 : vector<16x1xf32> to vector<16x64xf32>
    %220 = vector.broadcast %218 : vector<1x64xf32> to vector<16x64xf32>
    %221 = arith.mulf %219, %220 : vector<16x64xf32>
    %222 = arith.addf %215, %221 : vector<16x64xf32>
    %223 = vector.extract_strided_slice %84 {offsets = [7, 0, 0], sizes = [1, 16, 1], strides = [1, 1, 1]} : vector<8x16x1xf32> to vector<1x16x1xf32>
    %224 = vector.shape_cast %223 : vector<1x16x1xf32> to vector<16x1xf32>
    %225 = vector.broadcast %224 : vector<16x1xf32> to vector<16x64xf32>
    %226 = arith.mulf %225, %222 : vector<16x64xf32>
    %cst_64 = arith.constant dense<0.000000e+00> : vector<64xf32>
    %227 = vector.multi_reduction <add>, %226, %cst_64 [0] : vector<16x64xf32> to vector<64xf32>
    %228 = vector.shape_cast %227 : vector<64xf32> to vector<1x64xf32>
    %229 = tpu.concatenate %116, %132, %148, %164, %180, %196, %212, %228 in 0 : vector<1x64xf32>, vector<1x64xf32>, vector<1x64xf32>, vector<1x64xf32>, vector<1x64xf32>, vector<1x64xf32>, vector<1x64xf32>, vector<1x64xf32> -> vector<8x64xf32>
    %230 = arith.index_cast %76 : i32 to index
    %c0_65 = arith.constant 0 : index
    %231 = vector.load %arg17[%230, %c0_65] : memref<8x64xf32, #tpu.memory_space<vmem>>, vector<8x64xf32>
    tpu.vector_store %arg17[%230, %c0_65], %229 {strides = array<i32>} : memref<8x64xf32, #tpu.memory_space<vmem>>, vector<8x64xf32>,
    %c1_i32 = arith.constant 1 : i32
    %c0_66 = arith.constant 0 : index
    %c0_67 = arith.constant 0 : index
    %232 = vector.load %arg17[%c0_66, %c0_67] : memref<8x64xf32, #tpu.memory_space<vmem>>, vector<8x64xf32>
    %c0_68 = arith.constant 0 : index
    %c0_69 = arith.constant 0 : index
    %233 = vector.load %arg15[%c0_68, %c0_69] : memref<8x64xf32, #tpu.memory_space<vmem>>, vector<8x64xf32>
    %234 = vector.broadcast %12 : vector<1x64xf32> to vector<8x64xf32>
    %235 = arith.mulf %234, %233 : vector<8x64xf32>
    %236 = arith.addf %232, %235 : vector<8x64xf32>
    %c0_70 = arith.constant 0 : index
    %c0_71 = arith.constant 0 : index
    %237 = vector.load %arg16[%c0_70, %c0_71] : memref<8x64xf32, #tpu.memory_space<vmem>>, vector<8x64xf32>
    %238 = arith.mulf %236, %237 : vector<8x64xf32>
    %239 = arith.truncf %238 : vector<8x64xf32> to vector<8x64xbf16>
    %cst_72 = arith.constant dense<0.000000e+00> : vector<8x32xf32>
    %240 = tpu.matmul %239, %20, %cst_72 {dimension_numbers = #tpu.dot_dimension_numbers<[1], [0], [0], [1], [0, 0, 1, 1], [], []>} : vector<8x64xbf16>, vector<64x32xbf16>, vector<8x32xf32> -> vector<8x32xf32>
    %241 = arith.addf %27, %240 : vector<8x32xf32>
    %242 = arith.index_cast %24 : i32 to index
    %c0_73 = arith.constant 0 : index
    %243 = vector.load %arg19[%242, %c0_73] : memref<8x32xf32, #tpu.memory_space<vmem>>, vector<8x32xf32>
    tpu.vector_store %arg19[%242, %c0_73], %241 {strides = array<i32>} : memref<8x32xf32, #tpu.memory_space<vmem>>, vector<8x32xf32>,
    %c1_i32_74 = arith.constant 1 : i32
    %c1 = arith.constant 1 : index
    %c0_75 = arith.constant 0 : index
    %c0_76 = arith.constant 0 : index
    %244 = vector.load %arg8[%c1, %c0_75, %c0_76] : memref<2x16x64xf32, #tpu.memory_space<vmem>>, vector<1x16x64xf32>
    %245 = vector.shape_cast %244 : vector<1x16x64xf32> to vector<16x64xf32>
    %246 = math.exp %245 : vector<16x64xf32>
    %cst_77 = arith.constant 0.000000e+00 : f32
    %247 = vector.broadcast %cst_77 : f32 to vector<16x64xf32>
    %248 = arith.subf %247, %246 : vector<16x64xf32>
    %c1_78 = arith.constant 1 : index
    %c0_79 = arith.constant 0 : index
    %c0_80 = arith.constant 0 : index
    %249 = vector.load %arg3[%c1_78, %c0_79, %c0_80] : memref<2x4x64xf32, #tpu.memory_space<vmem>>, vector<1x4x64xf32>
    %250 = vector.shape_cast %249 : vector<1x4x64xf32> to vector<4x64xf32>
    %c1_81 = arith.constant 1 : index
    %c0_82 = arith.constant 0 : index
    %c0_83 = arith.constant 0 : index
    %251 = vector.load %arg4[%c1_81, %c0_82, %c0_83] : memref<2x1x64xf32, #tpu.memory_space<vmem>>, vector<1x1x64xf32>
    %252 = vector.shape_cast %251 : vector<1x1x64xf32> to vector<1x64xf32>
    %c1_84 = arith.constant 1 : index
    %c0_85 = arith.constant 0 : index
    %c0_86 = arith.constant 0 : index
    %253 = vector.load %arg7[%c1_84, %c0_85, %c0_86] : memref<2x1x64xf32, #tpu.memory_space<vmem>>, vector<1x1x64xf32>
    %254 = vector.shape_cast %253 : vector<1x1x64xf32> to vector<1x64xf32>
    %c1_87 = arith.constant 1 : index
    %c0_88 = arith.constant 0 : index
    %c0_89 = arith.constant 0 : index
    %255 = vector.load %arg9[%c1_87, %c0_88, %c0_89] : memref<2x1x64xf32, #tpu.memory_space<vmem>>, vector<1x1x64xf32>
    %256 = vector.shape_cast %255 : vector<1x1x64xf32> to vector<1x64xf32>
    %c1_90 = arith.constant 1 : index
    %c0_91 = arith.constant 0 : index
    %c0_92 = arith.constant 0 : index
    %257 = vector.load %arg2[%c1_90, %c0_91, %c0_92] : memref<2x32x128xbf16, #tpu.memory_space<vmem>>, vector<1x32x128xbf16>
    %258 = vector.shape_cast %257 : vector<1x32x128xbf16> to vector<32x128xbf16>
    %c1_93 = arith.constant 1 : index
    %c0_94 = arith.constant 0 : index
    %c0_95 = arith.constant 0 : index
    %259 = vector.load %arg5[%c1_93, %c0_94, %c0_95] : memref<2x64x128xbf16, #tpu.memory_space<vmem>>, vector<1x64x128xbf16>
    %260 = vector.shape_cast %259 : vector<1x64x128xbf16> to vector<64x128xbf16>
    %c1_96 = arith.constant 1 : index
    %c0_97 = arith.constant 0 : index
    %c0_98 = arith.constant 0 : index
    %261 = vector.load %arg6[%c1_96, %c0_97, %c0_98] : memref<2x128x64xbf16, #tpu.memory_space<vmem>>, vector<1x128x64xbf16>
    %262 = vector.shape_cast %261 : vector<1x128x64xbf16> to vector<128x64xbf16>
    %c1_99 = arith.constant 1 : index
    %c0_100 = arith.constant 0 : index
    %c0_101 = arith.constant 0 : index
    %263 = vector.load %arg10[%c1_99, %c0_100, %c0_101] : memref<2x64x32xbf16, #tpu.memory_space<vmem>>, vector<1x64x32xbf16>
    %264 = vector.shape_cast %263 : vector<1x64x32xbf16> to vector<64x32xbf16>
    %cst_102 = arith.constant 0.000000e+00 : f32
    %265 = vector.broadcast %cst_102 : f32 to vector<16x64xf32>
    %cst_103 = arith.constant 0.000000e+00 : f32
    %266 = vector.broadcast %cst_103 : f32 to vector<3x64xf32>
    %c0_i32_104 = arith.constant 0 : i32
    %c8_i32_105 = arith.constant 8 : i32
    %267 = arith.muli %c0_i32_104, %c8_i32_105 : i32
    %c0_i32_106 = arith.constant 0 : i32
    %268 = arith.subi %c0_i32_106, %267 : i32
    %269 = tpu.assume_multiple %268, 8 : i32
    %c0_107 = arith.constant 0 : index
    %270 = arith.index_cast %269 : i32 to index
    %c0_108 = arith.constant 0 : index
    %271 = vector.load %arg1[%c0_107, %270, %c0_108] : memref<1x8x32xf32, #tpu.memory_space<vmem>>, vector<1x8x32xf32>
    %272 = vector.shape_cast %271 : vector<1x8x32xf32> to vector<8x32xf32>
    %273 = arith.truncf %272 : vector<8x32xf32> to vector<8x32xbf16>
    %cst_109 = arith.constant dense<0.000000e+00> : vector<8x128xf32>
    %274 = tpu.matmul %273, %258, %cst_109 {dimension_numbers = #tpu.dot_dimension_numbers<[1], [0], [0], [1], [0, 0, 1, 1], [], []>} : vector<8x32xbf16>, vector<32x128xbf16>, vector<8x128xf32> -> vector<8x128xf32>
    %275 = vector.extract_strided_slice %274 {offsets = [0, 0], sizes = [8, 64], strides = [1, 1]} : vector<8x128xf32> to vector<8x64xf32>
    %276 = vector.extract_strided_slice %274 {offsets = [0, 64], sizes = [8, 64], strides = [1, 1]} : vector<8x128xf32> to vector<8x64xf32>
    %277 = arith.negf %276 : vector<8x64xf32>
    %278 = math.exp %277 : vector<8x64xf32>
    %cst_110 = arith.constant 1.000000e+00 : f32
    %279 = vector.broadcast %cst_110 : f32 to vector<8x64xf32>
    %280 = arith.addf %279, %278 : vector<8x64xf32>
    %281 = arith.divf %279, %280 : vector<8x64xf32>
    %282 = arith.mulf %276, %281 : vector<8x64xf32>
    %c0_111 = arith.constant 0 : index
    %c0_112 = arith.constant 0 : index
    %283 = vector.load %arg16[%c0_111, %c0_112] : memref<8x64xf32, #tpu.memory_space<vmem>>, vector<8x64xf32>
    tpu.vector_store %arg16[%c0_111, %c0_112], %282 {strides = array<i32>} : memref<8x64xf32, #tpu.memory_space<vmem>>, vector<8x64xf32>,
    %c0_113 = arith.constant 0 : index
    %c0_114 = arith.constant 0 : index
    %284 = vector.load %arg14[%c0_113, %c0_114] : memref<16x64xf32, #tpu.memory_space<vmem>>, vector<8x64xf32>
    tpu.vector_store %arg14[%c0_113, %c0_114], %275 {strides = array<i32>} : memref<16x64xf32, #tpu.memory_space<vmem>>, vector<8x64xf32>,
    %cst_115 = arith.constant 0.000000e+00 : f32
    %285 = vector.broadcast %cst_115 : f32 to vector<8x64xf32>
    %c8_116 = arith.constant 8 : index
    %c0_117 = arith.constant 0 : index
    %286 = vector.load %arg14[%c8_116, %c0_117] : memref<16x64xf32, #tpu.memory_space<vmem>>, vector<8x64xf32>
    tpu.vector_store %arg14[%c8_116, %c0_117], %285 {strides = array<i32>} : memref<16x64xf32, #tpu.memory_space<vmem>>, vector<8x64xf32>,
    %c8_118 = arith.constant 8 : index
    %c0_119 = arith.constant 0 : index
    %287 = vector.load %arg14[%c8_118, %c0_119] : memref<16x64xf32, #tpu.memory_space<vmem>>, vector<3x64xf32>
    tpu.vector_store %arg14[%c8_118, %c0_119], %266 {strides = array<i32>} : memref<16x64xf32, #tpu.memory_space<vmem>>, vector<3x64xf32>,
    %c3 = arith.constant 3 : index
    %c0_120 = arith.constant 0 : index
    %288 = vector.load %arg14[%c3, %c0_120] : memref<16x64xf32, #tpu.memory_space<vmem>>, vector<8x64xf32>
    %289 = vector.extract_strided_slice %250 {offsets = [0, 0], sizes = [1, 64], strides = [1, 1]} : vector<4x64xf32> to vector<1x64xf32>
    %290 = vector.broadcast %289 : vector<1x64xf32> to vector<8x64xf32>
    %291 = arith.mulf %288, %290 : vector<8x64xf32>
    %292 = vector.broadcast %252 : vector<1x64xf32> to vector<8x64xf32>
    %293 = arith.addf %292, %291 : vector<8x64xf32>
    %c2 = arith.constant 2 : index
    %c0_121 = arith.constant 0 : index
    %294 = vector.load %arg14[%c2, %c0_121] : memref<16x64xf32, #tpu.memory_space<vmem>>, vector<8x64xf32>
    %295 = vector.extract_strided_slice %250 {offsets = [1, 0], sizes = [1, 64], strides = [1, 1]} : vector<4x64xf32> to vector<1x64xf32>
    %296 = vector.broadcast %295 : vector<1x64xf32> to vector<8x64xf32>
    %297 = arith.mulf %294, %296 : vector<8x64xf32>
    %298 = arith.addf %293, %297 : vector<8x64xf32>
    %c1_122 = arith.constant 1 : index
    %c0_123 = arith.constant 0 : index
    %299 = vector.load %arg14[%c1_122, %c0_123] : memref<16x64xf32, #tpu.memory_space<vmem>>, vector<8x64xf32>
    %300 = vector.extract_strided_slice %250 {offsets = [2, 0], sizes = [1, 64], strides = [1, 1]} : vector<4x64xf32> to vector<1x64xf32>
    %301 = vector.broadcast %300 : vector<1x64xf32> to vector<8x64xf32>
    %302 = arith.mulf %299, %301 : vector<8x64xf32>
    %303 = arith.addf %298, %302 : vector<8x64xf32>
    %c0_124 = arith.constant 0 : index
    %c0_125 = arith.constant 0 : index
    %304 = vector.load %arg14[%c0_124, %c0_125] : memref<16x64xf32, #tpu.memory_space<vmem>>, vector<8x64xf32>
    %305 = vector.extract_strided_slice %250 {offsets = [3, 0], sizes = [1, 64], strides = [1, 1]} : vector<4x64xf32> to vector<1x64xf32>
    %306 = vector.broadcast %305 : vector<1x64xf32> to vector<8x64xf32>
    %307 = arith.mulf %304, %306 : vector<8x64xf32>
    %308 = arith.addf %303, %307 : vector<8x64xf32>
    %309 = vector.extract_strided_slice %275 {offsets = [0, 0], sizes = [3, 64], strides = [1, 1]} : vector<8x64xf32> to vector<3x64xf32>
    %310 = arith.negf %308 : vector<8x64xf32>
    %311 = math.exp %310 : vector<8x64xf32>
    %cst_126 = arith.constant 1.000000e+00 : f32
    %312 = vector.broadcast %cst_126 : f32 to vector<8x64xf32>
    %313 = arith.addf %312, %311 : vector<8x64xf32>
    %314 = arith.divf %312, %313 : vector<8x64xf32>
    %315 = arith.mulf %308, %314 : vector<8x64xf32>
    %c0_127 = arith.constant 0 : index
    %c0_128 = arith.constant 0 : index
    %316 = vector.load %arg15[%c0_127, %c0_128] : memref<8x64xf32, #tpu.memory_space<vmem>>, vector<8x64xf32>
    tpu.vector_store %arg15[%c0_127, %c0_128], %315 {strides = array<i32>} : memref<8x64xf32, #tpu.memory_space<vmem>>, vector<8x64xf32>,
    %317 = arith.truncf %315 : vector<8x64xf32> to vector<8x64xbf16>
    %cst_129 = arith.constant dense<0.000000e+00> : vector<8x128xf32>
    %318 = tpu.matmul %317, %260, %cst_129 {dimension_numbers = #tpu.dot_dimension_numbers<[1], [0], [0], [1], [0, 0, 1, 1], [], []>} : vector<8x64xbf16>, vector<64x128xbf16>, vector<8x128xf32> -> vector<8x128xf32>
    %c0_130 = arith.constant 0 : index
    %c0_131 = arith.constant 0 : index
    %319 = vector.load %arg18[%c0_130, %c0_131] : memref<8x128xf32, #tpu.memory_space<vmem>>, vector<8x128xf32>
    tpu.vector_store %arg18[%c0_130, %c0_131], %318 {strides = array<i32>} : memref<8x128xf32, #tpu.memory_space<vmem>>, vector<8x128xf32>,
    %c0_i32_132 = arith.constant 0 : i32
    %c8_i32_133 = arith.constant 8 : i32
    %320 = arith.muli %c0_i32_132, %c8_i32_133 : i32
    %c0_i32_134 = arith.constant 0 : i32
    %321 = arith.subi %c0_i32_134, %320 : i32
    %322 = tpu.assume_multiple %321, 8 : i32
    %323 = arith.index_cast %322 : i32 to index
    %c0_135 = arith.constant 0 : index
    %324 = vector.load %arg18[%323, %c0_135] : memref<8x128xf32, #tpu.memory_space<vmem>>, vector<8x128xf32>
    %325 = arith.index_cast %322 : i32 to index
    %c0_136 = arith.constant 0 : index
    %326 = vector.load %arg15[%325, %c0_136] : memref<8x64xf32, #tpu.memory_space<vmem>>, vector<8x64xf32>
    %327 = vector.extract_strided_slice %324 {offsets = [0, 0], sizes = [8, 16], strides = [1, 1]} : vector<8x128xf32> to vector<8x16xf32>
    %328 = vector.shape_cast %327 : vector<8x16xf32> to vector<8x16x1xf32>
    %329 = vector.extract_strided_slice %324 {offsets = [0, 16], sizes = [8, 16], strides = [1, 1]} : vector<8x128xf32> to vector<8x16xf32>
    %330 = vector.shape_cast %329 : vector<8x16xf32> to vector<8x16x1xf32>
    %331 = arith.truncf %324 : vector<8x128xf32> to vector<8x128xbf16>
    %cst_137 = arith.constant dense<0.000000e+00> : vector<8x64xf32>
    %332 = tpu.matmul %331, %262, %cst_137 {dimension_numbers = #tpu.dot_dimension_numbers<[1], [0], [0], [1], [0, 0, 1, 1], [], []>} : vector<8x128xbf16>, vector<128x64xbf16>, vector<8x64xf32> -> vector<8x64xf32>
    %333 = vector.broadcast %254 : vector<1x64xf32> to vector<8x64xf32>
    %334 = arith.addf %332, %333 : vector<8x64xf32>
    %cst_138 = arith.constant 2.000000e+01 : f32
    %335 = vector.broadcast %cst_138 : f32 to vector<8x64xf32>
    %336 = arith.cmpf ogt, %334, %335 : vector<8x64xf32>
    %337 = math.exp %334 : vector<8x64xf32>
    %338 = math.log1p %337 : vector<8x64xf32>
    %339 = arith.select %336, %334, %338 : vector<8x64xi1>, vector<8x64xf32>
    %340 = vector.shape_cast %339 : vector<8x64xf32> to vector<8x1x64xf32>
    %341 = vector.shape_cast %248 : vector<16x64xf32> to vector<1x16x64xf32>
    %342 = vector.broadcast %340 : vector<8x1x64xf32> to vector<8x16x64xf32>
    %343 = vector.broadcast %341 : vector<1x16x64xf32> to vector<8x16x64xf32>
    %344 = arith.mulf %342, %343 : vector<8x16x64xf32>
    %345 = math.exp %344 : vector<8x16x64xf32>
    %346 = arith.mulf %339, %326 : vector<8x64xf32>
    %347 = vector.extract_strided_slice %345 {offsets = [7, 0, 0], sizes = [1, 16, 64], strides = [1, 1, 1]} : vector<8x16x64xf32> to vector<1x16x64xf32>
    %348 = vector.shape_cast %347 : vector<1x16x64xf32> to vector<16x64xf32>
    %349 = arith.mulf %348, %265 : vector<16x64xf32>
    %350 = vector.extract_strided_slice %328 {offsets = [7, 0, 0], sizes = [1, 16, 1], strides = [1, 1, 1]} : vector<8x16x1xf32> to vector<1x16x1xf32>
    %351 = vector.shape_cast %350 : vector<1x16x1xf32> to vector<16x1xf32>
    %352 = vector.extract_strided_slice %346 {offsets = [7, 0], sizes = [1, 64], strides = [1, 1]} : vector<8x64xf32> to vector<1x64xf32>
    %353 = vector.broadcast %351 : vector<16x1xf32> to vector<16x64xf32>
    %354 = vector.broadcast %352 : vector<1x64xf32> to vector<16x64xf32>
    %355 = arith.mulf %353, %354 : vector<16x64xf32>
    %356 = arith.addf %349, %355 : vector<16x64xf32>
    %357 = vector.extract_strided_slice %330 {offsets = [7, 0, 0], sizes = [1, 16, 1], strides = [1, 1, 1]} : vector<8x16x1xf32> to vector<1x16x1xf32>
    %358 = vector.shape_cast %357 : vector<1x16x1xf32> to vector<16x1xf32>
    %359 = vector.broadcast %358 : vector<16x1xf32> to vector<16x64xf32>
    %360 = arith.mulf %359, %356 : vector<16x64xf32>
    %cst_139 = arith.constant dense<0.000000e+00> : vector<64xf32>
    %361 = vector.multi_reduction <add>, %360, %cst_139 [0] : vector<16x64xf32> to vector<64xf32>
    %362 = vector.shape_cast %361 : vector<64xf32> to vector<1x64xf32>
    %363 = vector.extract_strided_slice %345 {offsets = [6, 0, 0], sizes = [1, 16, 64], strides = [1, 1, 1]} : vector<8x16x64xf32> to vector<1x16x64xf32>
    %364 = vector.shape_cast %363 : vector<1x16x64xf32> to vector<16x64xf32>
    %365 = arith.mulf %364, %356 : vector<16x64xf32>
    %366 = vector.extract_strided_slice %328 {offsets = [6, 0, 0], sizes = [1, 16, 1], strides = [1, 1, 1]} : vector<8x16x1xf32> to vector<1x16x1xf32>
    %367 = vector.shape_cast %366 : vector<1x16x1xf32> to vector<16x1xf32>
    %368 = vector.extract_strided_slice %346 {offsets = [6, 0], sizes = [1, 64], strides = [1, 1]} : vector<8x64xf32> to vector<1x64xf32>
    %369 = vector.broadcast %367 : vector<16x1xf32> to vector<16x64xf32>
    %370 = vector.broadcast %368 : vector<1x64xf32> to vector<16x64xf32>
    %371 = arith.mulf %369, %370 : vector<16x64xf32>
    %372 = arith.addf %365, %371 : vector<16x64xf32>
    %373 = vector.extract_strided_slice %330 {offsets = [6, 0, 0], sizes = [1, 16, 1], strides = [1, 1, 1]} : vector<8x16x1xf32> to vector<1x16x1xf32>
    %374 = vector.shape_cast %373 : vector<1x16x1xf32> to vector<16x1xf32>
    %375 = vector.broadcast %374 : vector<16x1xf32> to vector<16x64xf32>
    %376 = arith.mulf %375, %372 : vector<16x64xf32>
    %cst_140 = arith.constant dense<0.000000e+00> : vector<64xf32>
    %377 = vector.multi_reduction <add>, %376, %cst_140 [0] : vector<16x64xf32> to vector<64xf32>
    %378 = vector.shape_cast %377 : vector<64xf32> to vector<1x64xf32>
    %379 = vector.extract_strided_slice %345 {offsets = [5, 0, 0], sizes = [1, 16, 64], strides = [1, 1, 1]} : vector<8x16x64xf32> to vector<1x16x64xf32>
    %380 = vector.shape_cast %379 : vector<1x16x64xf32> to vector<16x64xf32>
    %381 = arith.mulf %380, %372 : vector<16x64xf32>
    %382 = vector.extract_strided_slice %328 {offsets = [5, 0, 0], sizes = [1, 16, 1], strides = [1, 1, 1]} : vector<8x16x1xf32> to vector<1x16x1xf32>
    %383 = vector.shape_cast %382 : vector<1x16x1xf32> to vector<16x1xf32>
    %384 = vector.extract_strided_slice %346 {offsets = [5, 0], sizes = [1, 64], strides = [1, 1]} : vector<8x64xf32> to vector<1x64xf32>
    %385 = vector.broadcast %383 : vector<16x1xf32> to vector<16x64xf32>
    %386 = vector.broadcast %384 : vector<1x64xf32> to vector<16x64xf32>
    %387 = arith.mulf %385, %386 : vector<16x64xf32>
    %388 = arith.addf %381, %387 : vector<16x64xf32>
    %389 = vector.extract_strided_slice %330 {offsets = [5, 0, 0], sizes = [1, 16, 1], strides = [1, 1, 1]} : vector<8x16x1xf32> to vector<1x16x1xf32>
    %390 = vector.shape_cast %389 : vector<1x16x1xf32> to vector<16x1xf32>
    %391 = vector.broadcast %390 : vector<16x1xf32> to vector<16x64xf32>
    %392 = arith.mulf %391, %388 : vector<16x64xf32>
    %cst_141 = arith.constant dense<0.000000e+00> : vector<64xf32>
    %393 = vector.multi_reduction <add>, %392, %cst_141 [0] : vector<16x64xf32> to vector<64xf32>
    %394 = vector.shape_cast %393 : vector<64xf32> to vector<1x64xf32>
    %395 = vector.extract_strided_slice %345 {offsets = [4, 0, 0], sizes = [1, 16, 64], strides = [1, 1, 1]} : vector<8x16x64xf32> to vector<1x16x64xf32>
    %396 = vector.shape_cast %395 : vector<1x16x64xf32> to vector<16x64xf32>
    %397 = arith.mulf %396, %388 : vector<16x64xf32>
    %398 = vector.extract_strided_slice %328 {offsets = [4, 0, 0], sizes = [1, 16, 1], strides = [1, 1, 1]} : vector<8x16x1xf32> to vector<1x16x1xf32>
    %399 = vector.shape_cast %398 : vector<1x16x1xf32> to vector<16x1xf32>
    %400 = vector.extract_strided_slice %346 {offsets = [4, 0], sizes = [1, 64], strides = [1, 1]} : vector<8x64xf32> to vector<1x64xf32>
    %401 = vector.broadcast %399 : vector<16x1xf32> to vector<16x64xf32>
    %402 = vector.broadcast %400 : vector<1x64xf32> to vector<16x64xf32>
    %403 = arith.mulf %401, %402 : vector<16x64xf32>
    %404 = arith.addf %397, %403 : vector<16x64xf32>
    %405 = vector.extract_strided_slice %330 {offsets = [4, 0, 0], sizes = [1, 16, 1], strides = [1, 1, 1]} : vector<8x16x1xf32> to vector<1x16x1xf32>
    %406 = vector.shape_cast %405 : vector<1x16x1xf32> to vector<16x1xf32>
    %407 = vector.broadcast %406 : vector<16x1xf32> to vector<16x64xf32>
    %408 = arith.mulf %407, %404 : vector<16x64xf32>
    %cst_142 = arith.constant dense<0.000000e+00> : vector<64xf32>
    %409 = vector.multi_reduction <add>, %408, %cst_142 [0] : vector<16x64xf32> to vector<64xf32>
    %410 = vector.shape_cast %409 : vector<64xf32> to vector<1x64xf32>
    %411 = vector.extract_strided_slice %345 {offsets = [3, 0, 0], sizes = [1, 16, 64], strides = [1, 1, 1]} : vector<8x16x64xf32> to vector<1x16x64xf32>
    %412 = vector.shape_cast %411 : vector<1x16x64xf32> to vector<16x64xf32>
    %413 = arith.mulf %412, %404 : vector<16x64xf32>
    %414 = vector.extract_strided_slice %328 {offsets = [3, 0, 0], sizes = [1, 16, 1], strides = [1, 1, 1]} : vector<8x16x1xf32> to vector<1x16x1xf32>
    %415 = vector.shape_cast %414 : vector<1x16x1xf32> to vector<16x1xf32>
    %416 = vector.extract_strided_slice %346 {offsets = [3, 0], sizes = [1, 64], strides = [1, 1]} : vector<8x64xf32> to vector<1x64xf32>
    %417 = vector.broadcast %415 : vector<16x1xf32> to vector<16x64xf32>
    %418 = vector.broadcast %416 : vector<1x64xf32> to vector<16x64xf32>
    %419 = arith.mulf %417, %418 : vector<16x64xf32>
    %420 = arith.addf %413, %419 : vector<16x64xf32>
    %421 = vector.extract_strided_slice %330 {offsets = [3, 0, 0], sizes = [1, 16, 1], strides = [1, 1, 1]} : vector<8x16x1xf32> to vector<1x16x1xf32>
    %422 = vector.shape_cast %421 : vector<1x16x1xf32> to vector<16x1xf32>
    %423 = vector.broadcast %422 : vector<16x1xf32> to vector<16x64xf32>
    %424 = arith.mulf %423, %420 : vector<16x64xf32>
    %cst_143 = arith.constant dense<0.000000e+00> : vector<64xf32>
    %425 = vector.multi_reduction <add>, %424, %cst_143 [0] : vector<16x64xf32> to vector<64xf32>
    %426 = vector.shape_cast %425 : vector<64xf32> to vector<1x64xf32>
    %427 = vector.extract_strided_slice %345 {offsets = [2, 0, 0], sizes = [1, 16, 64], strides = [1, 1, 1]} : vector<8x16x64xf32> to vector<1x16x64xf32>
    %428 = vector.shape_cast %427 : vector<1x16x64xf32> to vector<16x64xf32>
    %429 = arith.mulf %428, %420 : vector<16x64xf32>
    %430 = vector.extract_strided_slice %328 {offsets = [2, 0, 0], sizes = [1, 16, 1], strides = [1, 1, 1]} : vector<8x16x1xf32> to vector<1x16x1xf32>
    %431 = vector.shape_cast %430 : vector<1x16x1xf32> to vector<16x1xf32>
    %432 = vector.extract_strided_slice %346 {offsets = [2, 0], sizes = [1, 64], strides = [1, 1]} : vector<8x64xf32> to vector<1x64xf32>
    %433 = vector.broadcast %431 : vector<16x1xf32> to vector<16x64xf32>
    %434 = vector.broadcast %432 : vector<1x64xf32> to vector<16x64xf32>
    %435 = arith.mulf %433, %434 : vector<16x64xf32>
    %436 = arith.addf %429, %435 : vector<16x64xf32>
    %437 = vector.extract_strided_slice %330 {offsets = [2, 0, 0], sizes = [1, 16, 1], strides = [1, 1, 1]} : vector<8x16x1xf32> to vector<1x16x1xf32>
    %438 = vector.shape_cast %437 : vector<1x16x1xf32> to vector<16x1xf32>
    %439 = vector.broadcast %438 : vector<16x1xf32> to vector<16x64xf32>
    %440 = arith.mulf %439, %436 : vector<16x64xf32>
    %cst_144 = arith.constant dense<0.000000e+00> : vector<64xf32>
    %441 = vector.multi_reduction <add>, %440, %cst_144 [0] : vector<16x64xf32> to vector<64xf32>
    %442 = vector.shape_cast %441 : vector<64xf32> to vector<1x64xf32>
    %443 = vector.extract_strided_slice %345 {offsets = [1, 0, 0], sizes = [1, 16, 64], strides = [1, 1, 1]} : vector<8x16x64xf32> to vector<1x16x64xf32>
    %444 = vector.shape_cast %443 : vector<1x16x64xf32> to vector<16x64xf32>
    %445 = arith.mulf %444, %436 : vector<16x64xf32>
    %446 = vector.extract_strided_slice %328 {offsets = [1, 0, 0], sizes = [1, 16, 1], strides = [1, 1, 1]} : vector<8x16x1xf32> to vector<1x16x1xf32>
    %447 = vector.shape_cast %446 : vector<1x16x1xf32> to vector<16x1xf32>
    %448 = vector.extract_strided_slice %346 {offsets = [1, 0], sizes = [1, 64], strides = [1, 1]} : vector<8x64xf32> to vector<1x64xf32>
    %449 = vector.broadcast %447 : vector<16x1xf32> to vector<16x64xf32>
    %450 = vector.broadcast %448 : vector<1x64xf32> to vector<16x64xf32>
    %451 = arith.mulf %449, %450 : vector<16x64xf32>
    %452 = arith.addf %445, %451 : vector<16x64xf32>
    %453 = vector.extract_strided_slice %330 {offsets = [1, 0, 0], sizes = [1, 16, 1], strides = [1, 1, 1]} : vector<8x16x1xf32> to vector<1x16x1xf32>
    %454 = vector.shape_cast %453 : vector<1x16x1xf32> to vector<16x1xf32>
    %455 = vector.broadcast %454 : vector<16x1xf32> to vector<16x64xf32>
    %456 = arith.mulf %455, %452 : vector<16x64xf32>
    %cst_145 = arith.constant dense<0.000000e+00> : vector<64xf32>
    %457 = vector.multi_reduction <add>, %456, %cst_145 [0] : vector<16x64xf32> to vector<64xf32>
    %458 = vector.shape_cast %457 : vector<64xf32> to vector<1x64xf32>
    %459 = vector.extract_strided_slice %345 {offsets = [0, 0, 0], sizes = [1, 16, 64], strides = [1, 1, 1]} : vector<8x16x64xf32> to vector<1x16x64xf32>
    %460 = vector.shape_cast %459 : vector<1x16x64xf32> to vector<16x64xf32>
    %461 = arith.mulf %460, %452 : vector<16x64xf32>
    %462 = vector.extract_strided_slice %328 {offsets = [0, 0, 0], sizes = [1, 16, 1], strides = [1, 1, 1]} : vector<8x16x1xf32> to vector<1x16x1xf32>
    %463 = vector.shape_cast %462 : vector<1x16x1xf32> to vector<16x1xf32>
    %464 = vector.extract_strided_slice %346 {offsets = [0, 0], sizes = [1, 64], strides = [1, 1]} : vector<8x64xf32> to vector<1x64xf32>
    %465 = vector.broadcast %463 : vector<16x1xf32> to vector<16x64xf32>
    %466 = vector.broadcast %464 : vector<1x64xf32> to vector<16x64xf32>
    %467 = arith.mulf %465, %466 : vector<16x64xf32>
    %468 = arith.addf %461, %467 : vector<16x64xf32>
    %469 = vector.extract_strided_slice %330 {offsets = [0, 0, 0], sizes = [1, 16, 1], strides = [1, 1, 1]} : vector<8x16x1xf32> to vector<1x16x1xf32>
    %470 = vector.shape_cast %469 : vector<1x16x1xf32> to vector<16x1xf32>
    %471 = vector.broadcast %470 : vector<16x1xf32> to vector<16x64xf32>
    %472 = arith.mulf %471, %468 : vector<16x64xf32>
    %cst_146 = arith.constant dense<0.000000e+00> : vector<64xf32>
    %473 = vector.multi_reduction <add>, %472, %cst_146 [0] : vector<16x64xf32> to vector<64xf32>
    %474 = vector.shape_cast %473 : vector<64xf32> to vector<1x64xf32>
    %475 = tpu.concatenate %474, %458, %442, %426, %410, %394, %378, %362 in 0 : vector<1x64xf32>, vector<1x64xf32>, vector<1x64xf32>, vector<1x64xf32>, vector<1x64xf32>, vector<1x64xf32>, vector<1x64xf32>, vector<1x64xf32> -> vector<8x64xf32>
    %476 = arith.index_cast %322 : i32 to index
    %c0_147 = arith.constant 0 : index
    %477 = vector.load %arg17[%476, %c0_147] : memref<8x64xf32, #tpu.memory_space<vmem>>, vector<8x64xf32>
    tpu.vector_store %arg17[%476, %c0_147], %475 {strides = array<i32>} : memref<8x64xf32, #tpu.memory_space<vmem>>, vector<8x64xf32>,
    %c1_i32_148 = arith.constant 1 : i32
    %c0_149 = arith.constant 0 : index
    %c0_150 = arith.constant 0 : index
    %478 = vector.load %arg17[%c0_149, %c0_150] : memref<8x64xf32, #tpu.memory_space<vmem>>, vector<8x64xf32>
    %c0_151 = arith.constant 0 : index
    %c0_152 = arith.constant 0 : index
    %479 = vector.load %arg15[%c0_151, %c0_152] : memref<8x64xf32, #tpu.memory_space<vmem>>, vector<8x64xf32>
    %480 = vector.broadcast %256 : vector<1x64xf32> to vector<8x64xf32>
    %481 = arith.mulf %480, %479 : vector<8x64xf32>
    %482 = arith.addf %478, %481 : vector<8x64xf32>
    %c0_153 = arith.constant 0 : index
    %c0_154 = arith.constant 0 : index
    %483 = vector.load %arg16[%c0_153, %c0_154] : memref<8x64xf32, #tpu.memory_space<vmem>>, vector<8x64xf32>
    %484 = arith.mulf %482, %483 : vector<8x64xf32>
    %485 = arith.truncf %484 : vector<8x64xf32> to vector<8x64xbf16>
    %cst_155 = arith.constant dense<0.000000e+00> : vector<8x32xf32>
    %486 = tpu.matmul %485, %264, %cst_155 {dimension_numbers = #tpu.dot_dimension_numbers<[1], [0], [0], [1], [0, 0, 1, 1], [], []>} : vector<8x64xbf16>, vector<64x32xbf16>, vector<8x32xf32> -> vector<8x32xf32>
    %487 = arith.index_cast %269 : i32 to index
    %c0_156 = arith.constant 0 : index
    %488 = vector.load %arg19[%487, %c0_156] : memref<8x32xf32, #tpu.memory_space<vmem>>, vector<8x32xf32>
    %489 = arith.addf %488, %486 : vector<8x32xf32>
    %cst_157 = arith.constant dense<0.000000e+00> : vector<8xf32>
    %490 = vector.multi_reduction <add>, %489, %cst_157 [1] : vector<8x32xf32> to vector<8xf32>
    %491 = vector.shape_cast %490 : vector<8xf32> to vector<8x1xf32>
    %cst_158 = arith.constant 3.200000e+01 : f32
    %492 = vector.broadcast %cst_158 : f32 to vector<8x1xf32>
    %493 = arith.divf %491, %492 : vector<8x1xf32>
    %494 = vector.broadcast %493 : vector<8x1xf32> to vector<8x32xf32>
    %495 = arith.subf %489, %494 : vector<8x32xf32>
    %496 = arith.mulf %495, %495 : vector<8x32xf32>
    %cst_159 = arith.constant dense<0.000000e+00> : vector<8xf32>
    %497 = vector.multi_reduction <add>, %496, %cst_159 [1] : vector<8x32xf32> to vector<8xf32>
    %498 = vector.shape_cast %497 : vector<8xf32> to vector<8x1xf32>
    %cst_160 = arith.constant 3.200000e+01 : f32
    %499 = vector.broadcast %cst_160 : f32 to vector<8x1xf32>
    %500 = arith.divf %498, %499 : vector<8x1xf32>
    %cst_161 = arith.constant 9.99999974E-6 : f32
    %501 = vector.broadcast %cst_161 : f32 to vector<8x1xf32>
    %502 = arith.addf %500, %501 : vector<8x1xf32>
    %503 = math.rsqrt %502 : vector<8x1xf32>
    %504 = vector.broadcast %503 : vector<8x1xf32> to vector<8x32xf32>
    %505 = arith.mulf %495, %504 : vector<8x32xf32>
    %c0_162 = arith.constant 0 : index
    %c0_163 = arith.constant 0 : index
    %506 = vector.load %arg11[%c0_162, %c0_163] : memref<1x32xf32, #tpu.memory_space<vmem>>, vector<1x32xf32>
    %507 = vector.broadcast %506 : vector<1x32xf32> to vector<8x32xf32>
    %508 = arith.mulf %505, %507 : vector<8x32xf32>
    %c0_164 = arith.constant 0 : index
    %c0_165 = arith.constant 0 : index
    %509 = vector.load %arg12[%c0_164, %c0_165] : memref<1x32xf32, #tpu.memory_space<vmem>>, vector<1x32xf32>
    %510 = vector.broadcast %509 : vector<1x32xf32> to vector<8x32xf32>
    %511 = arith.addf %508, %510 : vector<8x32xf32>
    %c0_166 = arith.constant 0 : index
    %512 = arith.index_cast %269 : i32 to index
    %c0_167 = arith.constant 0 : index
    %513 = vector.load %arg13[%c0_166, %512, %c0_167] : memref<1x8x32xf32, #tpu.memory_space<vmem>>, vector<1x8x32xf32>
    %514 = vector.shape_cast %513 : vector<1x8x32xf32> to vector<8x32xf32>
    %515 = vector.shape_cast %511 : vector<8x32xf32> to vector<1x8x32xf32>
    tpu.vector_store %arg13[%c0_166, %512, %c0_167], %515 {strides = array<i32>} : memref<1x8x32xf32, #tpu.memory_space<vmem>>, vector<1x8x32xf32>,
    %c1_i32_168 = arith.constant 1 : i32
    return
  }
  func.func @transform_0(%arg0: i32) -> (i32, i32, i32) {
    %c0_i32 = arith.constant 0 : i32
    %c0_i32_0 = arith.constant 0 : i32
    %c0_i32_1 = arith.constant 0 : i32
    return %arg0, %c0_i32, %c0_i32_0 : i32, i32, i32
  }
  func.func @transform_1(%arg0: i32) -> (i32, i32, i32) {
    %c0_i32 = arith.constant 0 : i32
    %c0_i32_0 = arith.constant 0 : i32
    %c0_i32_1 = arith.constant 0 : i32
    %c0_i32_2 = arith.constant 0 : i32
    return %c0_i32, %c0_i32_0, %c0_i32_1 : i32, i32, i32
  }
  func.func @transform_2(%arg0: i32) -> (i32, i32, i32) {
    %c0_i32 = arith.constant 0 : i32
    %c0_i32_0 = arith.constant 0 : i32
    %c0_i32_1 = arith.constant 0 : i32
    %c0_i32_2 = arith.constant 0 : i32
    return %c0_i32, %c0_i32_0, %c0_i32_1 : i32, i32, i32
  }
  func.func @transform_3(%arg0: i32) -> (i32, i32, i32) {
    %c0_i32 = arith.constant 0 : i32
    %c0_i32_0 = arith.constant 0 : i32
    %c0_i32_1 = arith.constant 0 : i32
    %c0_i32_2 = arith.constant 0 : i32
    return %c0_i32, %c0_i32_0, %c0_i32_1 : i32, i32, i32
  }
  func.func @transform_4(%arg0: i32) -> (i32, i32, i32) {
    %c0_i32 = arith.constant 0 : i32
    %c0_i32_0 = arith.constant 0 : i32
    %c0_i32_1 = arith.constant 0 : i32
    %c0_i32_2 = arith.constant 0 : i32
    return %c0_i32, %c0_i32_0, %c0_i32_1 : i32, i32, i32
  }
  func.func @transform_5(%arg0: i32) -> (i32, i32, i32) {
    %c0_i32 = arith.constant 0 : i32
    %c0_i32_0 = arith.constant 0 : i32
    %c0_i32_1 = arith.constant 0 : i32
    %c0_i32_2 = arith.constant 0 : i32
    return %c0_i32, %c0_i32_0, %c0_i32_1 : i32, i32, i32
  }
  func.func @transform_6(%arg0: i32) -> (i32, i32, i32) {
    %c0_i32 = arith.constant 0 : i32
    %c0_i32_0 = arith.constant 0 : i32
    %c0_i32_1 = arith.constant 0 : i32
    %c0_i32_2 = arith.constant 0 : i32
    return %c0_i32, %c0_i32_0, %c0_i32_1 : i32, i32, i32
  }
  func.func @transform_7(%arg0: i32) -> (i32, i32, i32) {
    %c0_i32 = arith.constant 0 : i32
    %c0_i32_0 = arith.constant 0 : i32
    %c0_i32_1 = arith.constant 0 : i32
    %c0_i32_2 = arith.constant 0 : i32
    return %c0_i32, %c0_i32_0, %c0_i32_1 : i32, i32, i32
  }
  func.func @transform_8(%arg0: i32) -> (i32, i32, i32) {
    %c0_i32 = arith.constant 0 : i32
    %c0_i32_0 = arith.constant 0 : i32
    %c0_i32_1 = arith.constant 0 : i32
    %c0_i32_2 = arith.constant 0 : i32
    return %c0_i32, %c0_i32_0, %c0_i32_1 : i32, i32, i32
  }
  func.func @transform_9(%arg0: i32) -> (i32, i32, i32) {
    %c0_i32 = arith.constant 0 : i32
    %c0_i32_0 = arith.constant 0 : i32
    %c0_i32_1 = arith.constant 0 : i32
    %c0_i32_2 = arith.constant 0 : i32
    return %c0_i32, %c0_i32_0, %c0_i32_1 : i32, i32, i32
  }
  func.func @transform_10(%arg0: i32) -> (i32, i32) {
    %c0_i32 = arith.constant 0 : i32
    %c0_i32_0 = arith.constant 0 : i32
    %c0_i32_1 = arith.constant 0 : i32
    return %c0_i32, %c0_i32_0 : i32, i32
  }
  func.func @transform_11(%arg0: i32) -> (i32, i32) {
    %c0_i32 = arith.constant 0 : i32
    %c0_i32_0 = arith.constant 0 : i32
    %c0_i32_1 = arith.constant 0 : i32
    return %c0_i32, %c0_i32_0 : i32, i32
  }
  func.func @transform_12(%arg0: i32) -> (i32, i32, i32) {
    %c0_i32 = arith.constant 0 : i32
    %c0_i32_0 = arith.constant 0 : i32
    %c0_i32_1 = arith.constant 0 : i32
    return %arg0, %c0_i32, %c0_i32_0 : i32, i32, i32
  }
}

</mosaic_0001>

<bundles_post_ra>
// kernel: bimamba_block_forward.1
= control target key start
LH: loop header
LB: loop body
LE: loop exit
PB: predicated region body
PF: predicated region fallthrough
CT: control target
= control target key end

     0   :  { %s3596_s0 = inlined_call_operand.vmem [shape: f32[2,8,32], index: 0, kind: input, shape index: {}]   ;;  %s3597_s1 = inlined_call_operand.vmem [shape: bf16[2,32,128], index: 1, kind: input, shape index: {}]   ;;  %s3598_s2 = inlined_call_operand.vmem [shape: f32[2,4,64], index: 2, kind: input, shape index: {}]   ;;  %s3599_s3 = inlined_call_operand.vmem [shape: f32[2,1,64], index: 3, kind: input, shape index: {}]   ;;  %s3600_s4 = inlined_call_operand.vmem [shape: bf16[2,64,128], index: 4, kind: input, shape index: {}]   ;;  %s3601_s5 = inlined_call_operand.vmem [shape: bf16[2,128,64], index: 5, kind: input, shape index: {}]   ;;  %s3602_s6 = inlined_call_operand.vmem [shape: f32[2,1,64], index: 6, kind: input, shape index: {}]   ;;  %s3603_s7 = inlined_call_operand.vmem [shape: f32[2,16,64], index: 7, kind: input, shape index: {}]   ;;  %s3604_s8 = inlined_call_operand.vmem [shape: f32[2,1,64], index: 8, kind: input, shape index: {}]   ;;  %s3605_s9 = inlined_call_operand.vmem [shape: bf16[2,64,32], index: 9, kind: input, shape index: {}]   ;;  %s3606_s10 = inlined_call_operand.vmem [shape: f32[1,32], index: 10, kind: input, shape index: {}]   ;;  %s3607_s11 = inlined_call_operand.vmem [shape: f32[1,32], index: 11, kind: input, shape index: {}]   ;;  %s3608_s12 = inlined_call_operand.hbm [shape: f32[2,8,32], index: 12, kind: output, shape index: {}]  }
   0x1   :  { %3610 = sst [smem:[#allocation11_spill]] %s3596_s0 }
   0x2   :  { %3611 = sst [smem:[#allocation12_spill]] %s3597_s1 }
   0x3   :  { %3612 = sst [smem:[#allocation13_spill]] %s3598_s2 }
   0x4   :  { %3613 = sst [smem:[#allocation14_spill]] %s3599_s3 }
   0x5   :  { %17 = vsyncpa [#allocation9], 0 }
   0x6   :  { %19 = vsyncpa [#allocation9 + $0x1], 0  ;;  %s2877_s21 = smov 0   ;;  %s2879_s22 = smov 0  }
   0x7   :  { %s2881_s23 = smov 0   ;;  %s2883_s24 = smov 0  }
   0x8 LB: > { %s2898_s25 = sadd.s32 4294967295, %s2805_s24   ;;  %s2313_s26 = sadd.s32 4294967294, %s2805_s24   ;;  %s2805_s24 = sphi %s2883_s24, %s3624_s24   ;;  %s2801_s23 = sphi %s2881_s23, %s3623_s23   ;;  %s2797_s22 = sphi %s2879_s22, %s3622_s22   ;;  %s2793_s21 = sphi %s2877_s21, %s3621_s21  }
   0x9   : > { %s2902_s27 = sadd.s32 1, %s2805_s24   ;;  %s289_s28 = sadd.s32 1, %s2801_s23 }
   0xa   : > { %s286_s29 = ssub.s32 %s2805_s24, %s2902_s27  ;;  %p299_p0 = scmp.ne.s32.totalorder %s2801_s23, %s2797_s22 }
   0xb   : > { %p287_p1 = scmp.eq.s32.totalorder %s286_s29, 0  ;;  %p300_p2 = scmp.eq.s32.totalorder %s2898_s25, 1 }
   0xc   : > { %p305_p3 = scmp.ne.s32.totalorder %s2797_s22, %s2793_s21  ;;  %p306_p4 = scmp.eq.s32.totalorder %s2313_s26, 1 }
   0xd   : > { %s2913_s30 = scalar_select %p287_p1, %s2801_s23, %s289_s28  }
   0xe   : > { %p2915_p5 = por %p300_p2, %p299_p0  ;;  %p2919_p6 = por %p306_p4, %p305_p3 }
   0xf   : > { %p2316_p7 = scmp.ge.s32.totalorder %s2805_s24, 1  ;;  %p364_p8 = scmp.lt.s32.totalorder %s2805_s24, 3 }
  0x11   : > { %p365_p9 = pnand %p2316_p7, %p364_p8 }
  0x12   : > { %s3616_s1 = sld [smem:[#allocation12_spill]] (!%p365_p9)  ;;  %p405_p10 = scmp.lt.s32.totalorder (!%p365_p9), %s2898_s25, 1 }
  0x13   : > { %368 = sbr.rel (%p365_p9) target bundleno = 2093 (0x82d), region = 68  ;;  %s3617_s0 = sld [smem:[#allocation11_spill]] (!%p365_p9) }
  0x14   : > { %s3618_s2 = sld [smem:[#allocation13_spill]] (!%p365_p9)  ;;  %s3620_s18 = smov (!%p365_p9), 64  }
  0x15   : > { %s3619_s3 = sld [smem:[#allocation14_spill]] (!%p365_p9)  ;;  %s402_s17 = sand.u32 (!%p365_p9), 1, %s2797_s22  }
  0x16   : > { %s2811_s26 = smov (!%p365_p9), [#allocation8]  }
  0x18   : > { %v2610_v0 = vld [vmem:[%s3616_s1 + $0x8] sm:$0xff]   ;;  %v2807_v1 = vmov 0.0   ;;  %v2611_v2 = vld [vmem:[%s3616_s1] sm:$0xff]   ;;  %vm2808_vm0 = vmmov 0   ;;  %s406_s19 = scalar_select %p405_p10, %s2898_s25, 1  ;;  %vm472_vm1 = vcmask 261120   ;;  %v534_v16 = vlaneseq }
  0x19   : > { %2463 = vmatprep.subr.bf16.mxu0 %v2807_v1  ;;  %2471 = vmatprep.subr.bf16.mxu1 %v2807_v1  ;;  %vm527_vm2 = vcmask 523264   ;;  %vm530_vm3 = vcmask 518144   ;;  %v2612_v5 = vld [vmem:[%s3600_s4 + $0x18] sm:$0xff]   ;;  %v2613_v6 = vld [vmem:[%s3600_s4 + $0x10] sm:$0xff]   ;;  %v2614_v7 = vld [vmem:[%s3600_s4 + $0x8] sm:$0xff]   ;;  %vm1213_vm6 = vcmask 1040384  }
  0x1a   : > { %2464 = vmatpush3.bf16.msra.mxu0 %v2610_v0  ;;  %2467 = vmatprep.mubr.msk.bf16.mxu0 %vm2808_vm0, %v2807_v1  ;;  %s2318_s20 = sshll.u32 %s406_s19, 3  ;;  %529 = vst.msk [vmem:[#allocation2] sm:$0xff] %vm527_vm2, %v2807_v1  ;;  %v2615_v8 = vld [vmem:[%s3600_s4] sm:$0xff]   ;;  %v2616_v9 = vld [vmem:[%s3601_s5 + $0x38] sm:$0xff]   ;;  %v2617_v10 = vld [vmem:[%s3601_s5 + $0x30] sm:$0xff]   ;;  %v3001_v17 = vshrl.u32 %v534_v16, 7 }
  0x1b   : > { %2465 = vmatprep.subr.bf16.mxu0 %v2807_v1  ;;  %2479 = vmatprep.mubr.msk.bf16.mxu1 %vm2808_vm0, %v2807_v1  ;;  %s2943_s29 = scalar_lea.vmem %s3617_s0, %s2318_s20  ;;  %531 = vst.msk [vmem:[#allocation2 + $0x5] sm:$0x7] %vm530_vm3, %v2807_v1  ;;  %v2618_v11 = vld [vmem:[%s3601_s5 + $0x28] sm:$0xff]   ;;  %v2619_v12 = vld [vmem:[%s3601_s5 + $0x20] sm:$0xff]   ;;  %v2620_v13 = vld [vmem:[%s3601_s5 + $0x18] sm:$0xff]   ;;  %s3609_s19 = smov 64  }
  0x1c   : > { %v458_v3 = vld [vmem:[%s2943_s29] sm:$0xff]  ;;  %2472 = vmatpush3.bf16.msra.mxu1 %v2612_v5  ;;  %v2621_v14 = vld [vmem:[%s3601_s5 + $0x10] sm:$0xff]   ;;  %v2622_v15 = vld [vmem:[%s3601_s5 + $0x8] sm:$0xff]   ;;  %v3008_v19 = vsub.s32 0, %v3001_v17  ;;  %v3014_v22 = vsub.s32 1, %v3001_v17  ;;  %v3018_v25 = vsub.s32 2, %v3001_v17 }
  0x1d   : > { %v2947_v4 = vpack.c.bf16 %v458_v3, %v458_v3  ;;  %2473 = vmatprep.subr.bf16.mxu1 %v2807_v1  ;;  %v418_v21 = vld [vmem:[%s3618_s2] sm:$0xf]  ;;  %v3022_v28 = vsub.s32 3, %v3001_v17  ;;  %v3048_v60 = vsub.s32 4, %v3001_v17  ;;  %v3052_v62 = vsub.s32 5, %v3001_v17 }
  0x1e   : > { %2466 = vmatpush3.bf16.msra.mxu0 %v2611_v2  ;;  %v537_v24 = vrot.slane %v418_v21, %v3008_v19  ;;  %v550_v27 = vrot.slane %v418_v21, %v3014_v22  ;;  %v2323_v29 = vld [vmem:[%s3619_s3] ss:$0 sm:$0xff]  ;;  %v557_v34 = vrot.slane %v418_v21, %v3018_v25  ;;  %v3056_v0 = vsub.s32 6, %v3001_v17 }
  0x1f   : > { %2483 = vmatprep.subr.bf16.mxu0 %v2807_v1  ;;  %v564_v38 = vrot.slane %v418_v21, %v3022_v28  ;;  %v2623_v50 = vld [vmem:[%s3601_s5] sm:$0xff]   ;;  %v3061_v5 = vsub.s32 7, %v3001_v17  ;;  %vm1215_vm7 = vcmask 1041408   ;;  %vm1217_vm8 = vcmask 1042432  }
  0x20   : > { %2474 = vmatpush3.bf16.msra.mxu1 %v2613_v6  ;;  %vm1219_vm9 = vcmask 1043456   ;;  %vm1221_vm10 = vcmask 1044480   ;;  %vm1223_vm11 = vcmask 1045504   ;;  %vm1225_vm12 = vcmask 1046528  }
  0x21   : > { %2468 = vmatmul.mubr.msk.bf16.vlgmr.msra.gmra.mxu0 %vm472_vm1, %v2947_v4  ;;  %2475 = vmatprep.subr.bf16.mxu1 %v2807_v1 }
  0x22   : > { %2499 = vmatprep.mubr.msk.bf16.mxu0 %vm2808_vm0, %v2807_v1  ;;  %2484 = vmatpush3.bf16.msra.mxu0 %v2616_v9 }
  0x23   : > { %2485 = vmatprep.subr.bf16.mxu0 %v2807_v1 }
  0x24   : > { %2476 = vmatpush3.bf16.msra.mxu1 %v2614_v7 }
  0x25   : > { %2477 = vmatprep.subr.bf16.mxu1 %v2807_v1 }
  0x26   : > { %2486 = vmatpush3.bf16.msra.mxu0 %v2617_v10 }
  0x27   : > { %2487 = vmatprep.subr.bf16.mxu0 %v2807_v1 }
  0x28   : > { %2478 = vmatpush3.bf16.msra.mxu1 %v2615_v8 }
  0x29   : > { %2503 = vmatprep.subr.bf16.mxu1 %v2807_v1 }
  0x2a   : > { %2488 = vmatpush3.bf16.msra.mxu0 %v2618_v11 }
  0x2b   : > { %2489 = vmatprep.subr.bf16.mxu0 %v2807_v1 }
  0x2e   : > { %2490 = vmatpush3.bf16.msra.mxu0 %v2619_v12 }
  0x2f   : > { %2491 = vmatprep.subr.bf16.mxu0 %v2807_v1 }
  0x32   : > { %2492 = vmatpush3.bf16.msra.mxu0 %v2620_v13 }
  0x33   : > { %2493 = vmatprep.subr.bf16.mxu0 %v2807_v1 }
  0x36   : > { %2494 = vmatpush3.bf16.msra.mxu0 %v2621_v14 }
  0x37   : > { %2495 = vmatprep.subr.bf16.mxu0 %v2807_v1 }
  0x3a   : > { %2496 = vmatpush3.bf16.msra.mxu0 %v2622_v15 }
  0x3b   : > { %2497 = vmatprep.subr.bf16.mxu0 %v2807_v1 }
  0x3e   : > { %2498 = vmatpush3.bf16.msra.mxu0 %v2623_v50  ;;  %v411_v50 = vld [vmem:[%s3603_s7 + $0x8] sm:$0xff] }
  0x3f   : > { %2523 = vmatprep.subr.bf16.mxu0 %v2807_v1 }
  0xe1   : > { %v3003_v18 = vpop.f32.mrf.mxu0 }
  0xe2   : > { %532 = vst.msk [vmem:[#allocation2 + $0x8] sm:$0xff] %vm527_vm2, %v3003_v18  ;;  %v2322_v3 = vmul.f32 -1.442695, %v3003_v18 }
  0xe3   : > { %v2469_v20 = vpop.f32.mrf.mxu0 }
  0xe5   : > { %v513_v23 = vpop.f32.mrf.mxu0 }
  0xe7   : > { %v2470_v26 = vpop.f32.mrf.mxu0 }
  0xe9   : > { %v533_v30 = vld [vmem:[#allocation2 + $0x5] sm:$0xff] }
  0xea   : > { %v546_v31 = vld [vmem:[#allocation2 + $0x6] sm:$0xff]  ;;  %v538_v32 = vmul.f32 %v537_v24, %v533_v30 }
  0xeb   : > { %v553_v33 = vld [vmem:[#allocation2 + $0x7] sm:$0xff]  ;;  %v551_v37 = vmul.f32 %v550_v27, %v546_v31 }
  0xec   : > { %v560_v35 = vld [vmem:[#allocation2 + $0x8] sm:$0xff]  ;;  %v545_v36 = vadd.f32 %v2323_v29, %v538_v32  ;;  %v558_v40 = vmul.f32 %v557_v34, %v553_v33  ;;  %v2624_v33 = vld [vmem:[%s3605_s9 + $0x18] sm:$0xff]   ;;  %v2625_v34 = vld [vmem:[%s3605_s9 + $0x10] sm:$0xff]  }
  0xed   : > { %1437 = vst.msk [vmem:[#allocation2 + $0x8] sm:$0xff] %vm527_vm2, %v2807_v1  ;;  %v565_v42 = vmul.f32 %v564_v38, %v560_v35  ;;  %v2626_v35 = vld [vmem:[%s3605_s9 + $0x8] sm:$0xff]  }
  0xee   : > { %1438 = vst.msk [vmem:[#allocation2 + $0x8] sm:$0x7] %vm530_vm3, %v2807_v1  ;;  %v552_v39 = vadd.f32 %v551_v37, %v545_v36  ;;  %v2627_v36 = vld [vmem:[%s3605_s9] sm:$0xff]  }
  0xef   : > { %v2330_v37 = vld [vmem:[%s3602_s6] ss:$0 sm:$0xff] }
  0xf0   : > { %v559_v41 = vadd.f32 %v558_v40, %v552_v39 }
  0xf2   : > { %v566_v43 = vadd.f32 %v565_v42, %v559_v41 }
  0xf4   : > { %v2324_v44 = vmul.f32 -1.442695, %v566_v43 }
  0xf6   : > { %2646 = vpow2.f32 %v2324_v44 }
 0x103   : > { %v2647_v45 = vpop.eup %2646 }
 0x104   : > { %v570_v46 = vadd.f32 1.0, %v2647_v45 }
 0x106   : > { %2648 = vrcp.f32 %v570_v46 }
 0x107   : > { %2650 = vpow2.f32 %v2322_v3 }
 0x113   : > { %v2649_v47 = vpop.eup %2648 }
 0x114   : > { %v573_v48 = vmul.f32 %v2649_v47, %v566_v43  ;;  %v2651_v7 = vpop.eup %2650 }
 0x115   : > { %v519_v8 = vadd.f32 1.0, %v2651_v7 }
 0x116   : > { %574 = vst.msk [vmem:[#allocation3] sm:$0xff] %vm527_vm2, %v573_v48  ;;  %v575_v49 = vpack.c.bf16 %v573_v48, %v573_v48  ;;  %v410_v48 = vld [vmem:[%s3603_s7] sm:$0xff] }
 0x117   : > { %2652 = vrcp.f32 %v519_v8 }
 0x118   : > { %2480 = vmatmul.mubr.msk.bf16.vlgmr.msra.gmra.mxu1 %vm527_vm2, %v575_v49 }
 0x119   : > { %2511 = vmatprep.mubr.msk.bf16.mxu1 %vm2808_vm0, %v2807_v1  ;;  %2504 = vmatpush3.bf16.msra.mxu1 %v2624_v33 }
 0x11a   : > { %2505 = vmatprep.subr.bf16.mxu1 %v2807_v1 }
 0x11d   : > { %2506 = vmatpush3.bf16.msra.mxu1 %v2625_v34 }
 0x11e   : > { %2507 = vmatprep.subr.bf16.mxu1 %v2807_v1 }
 0x121   : > { %2508 = vmatpush3.bf16.msra.mxu1 %v2626_v35 }
 0x122   : > { %2509 = vmatprep.subr.bf16.mxu1 %v2807_v1 }
 0x124   : > { %v2653_v9 = vpop.eup %2652 }
 0x125   : > { %v522_v10 = vmul.f32 %v2653_v9, %v3003_v18  ;;  %2510 = vmatpush3.bf16.msra.mxu1 %v2627_v36 }
 0x126   : > { %2515 = vmatprep.subr.bf16.mxu1 %v2807_v1 }
 0x1d8   : > { %v637_v51 = vpop.f32.mrf.mxu1 }
 0x1d9   : > { %v798_v52 = vpack.c.bf16 %v637_v51, %v637_v51  ;;  %v660_v53 = vrot.slane %v637_v51, %v3014_v22  ;;  %v649_v54 = vrot.slane %v637_v51, %v3008_v19  ;;  %v671_v58 = vrot.slane %v637_v51, %v3018_v25 }
 0x1da   : > { %v2481_v55 = vpop.f32.mrf.mxu1  ;;  %v682_v59 = vrot.slane %v637_v51, %v3022_v28  ;;  %v693_v61 = vrot.slane %v637_v51, %v3048_v60  ;;  %v704_v63 = vrot.slane %v637_v51, %v3052_v62  ;;  %v715_v2 = vrot.slane %v637_v51, %v3056_v0 }
 0x1db   : > { %2500 = vmatmul.mubr.bf16.vlgmr.msra.gmra.mxu0 %v798_v52  ;;  %662 = vbcast.lane.b32.xlu1 %v660_v53, 256  ;;  %v726_v6 = vrot.slane %v637_v51, %v3061_v5  ;;  %v412_v51 = vmul.f32 1.442695, %v410_v48  ;;  %v414_v52 = vmul.f32 1.442695, %v411_v50 }
 0x1dc   : > { %651 = vbcast.lane.b32.xlu0 %v649_v54, 256  ;;  %v640_v56 = vpop.f32.mrf.mxu1  ;;  %2531 = vmatprep.mubr.msk.bf16.mxu0 %vm2808_vm0, %v2807_v1  ;;  %v2810_v55 = vmov 1966171168  }
 0x1dd   : > { %v909_v56 = vunpack.c.l.s4 %v2810_v55 }
 0x1de   : > { %v2482_v57 = vpop.f32.mrf.mxu1 }
 0x1df   : > { %666 = vbcast.lane.b32.xlu1 %v660_v53, 264 }
 0x1e0   : > { %655 = vbcast.lane.b32.xlu0 %v649_v54, 264 }
 0x1e3   : > { %677 = vbcast.lane.b32.xlu1 %v671_v58, 264 }
 0x1e4   : > { %673 = vbcast.lane.b32.xlu0 %v671_v58, 256 }
 0x1e7   : > { %688 = vbcast.lane.b32.xlu1 %v682_v59, 264 }
 0x1e8   : > { %684 = vbcast.lane.b32.xlu0 %v682_v59, 256 }
 0x1eb   : > { %699 = vbcast.lane.b32.xlu1 %v693_v61, 264 }
 0x1ec   : > { %695 = vbcast.lane.b32.xlu0 %v693_v61, 256 }
 0x1ef   : > { %710 = vbcast.lane.b32.xlu1 %v704_v63, 264 }
 0x1f0   : > { %706 = vbcast.lane.b32.xlu0 %v704_v63, 256 }
 0x1f3   : > { %721 = vbcast.lane.b32.xlu1 %v715_v2, 264 }
 0x1f4   : > { %717 = vbcast.lane.b32.xlu0 %v715_v2, 256 }
 0x1f7   : > { %740 = vbcast.lane.b32.xlu1 %v649_v54, 280 }
 0x1f8   : > { %736 = vbcast.lane.b32.xlu0 %v649_v54, 272 }
 0x1fb   : > { %748 = vbcast.lane.b32.xlu1 %v660_v53, 280 }
 0x1fc   : > { %744 = vbcast.lane.b32.xlu0 %v660_v53, 272 }
 0x1ff   : > { %756 = vbcast.lane.b32.xlu1 %v671_v58, 280 }
 0x200   : > { %752 = vbcast.lane.b32.xlu0 %v671_v58, 272  ;;  %v910_v58 = vunpack.c.0.s8 %v909_v56 }
 0x203   : > { %732 = vbcast.lane.b32.xlu1 %v726_v6, 264 }
 0x204   : > { %728 = vbcast.lane.b32.xlu0 %v726_v6, 256 }
 0x207   : > { %764 = vbcast.lane.b32.xlu1 %v682_v59, 280 }
 0x208   : > { %760 = vbcast.lane.b32.xlu0 %v682_v59, 272 }
 0x20b   : > { %772 = vbcast.lane.b32.xlu1 %v693_v61, 280 }
 0x20c   : > { %768 = vbcast.lane.b32.xlu0 %v693_v61, 272 }
 0x20f   : > { %780 = vbcast.lane.b32.xlu1 %v704_v63, 280 }
 0x210   : > { %776 = vbcast.lane.b32.xlu0 %v704_v63, 272 }
 0x213   : > { %788 = vbcast.lane.b32.xlu1 %v715_v2, 280 }
 0x214   : > { %784 = vbcast.lane.b32.xlu0 %v715_v2, 272 }
 0x217   : > { %796 = vbcast.lane.b32.xlu1 %v726_v6, 280 }
 0x218   : > { %792 = vbcast.lane.b32.xlu0 %v726_v6, 272  ;;  %v3135_v6 = vsub.s32 %v910_v58, %v3001_v17 }
 0x21c   : > { %524 = vrot.lane.b32.xlu0 %v522_v10, %s3609_s19  ;;  %s2749_s19 = sshll.u32 %s2811_s26, 4  ;;  %s2750_s19 = int_to_ptr.vmem [resolvable:$false] %s2749_s19 }
 0x24d   : > { %v3118_v44 = vpop.permute.xlu1 %662 }
 0x24e   : > { %v3066_v11 = vpop.permute.xlu0 %651 }
 0x251   : > { %v3120_v45 = vpop.permute.xlu1 %666 }
 0x252   : > { %v3068_v12 = vpop.permute.xlu0 %655 }
 0x255   : > { %v3125_v49 = vpop.permute.xlu1 %677 }
 0x256   : > { %v3070_v13 = vpop.permute.xlu0 %673 }
 0x259   : > { %v3130_v53 = vpop.permute.xlu1 %688 }
 0x25a   : > { %v3072_v14 = vpop.permute.xlu0 %684 }
 0x25d   : > { %v3132_v61 = vpop.permute.xlu1 %699 }
 0x25e   : > { %v3074_v15 = vpop.permute.xlu0 %695 }
 0x261   : > { %v3137_v9 = vpop.permute.xlu1 %710 }
 0x262   : > { %v3076_v16 = vpop.permute.xlu0 %706 }
 0x266   : > { %v3078_v20 = vpop.permute.xlu0 %717 }
 0x26a   : > { %v3080_v21 = vpop.permute.xlu0 %736 }
 0x26e   : > { %v3082_v18 = vpop.permute.xlu0 %744 }
 0x272   : > { %v3084_v23 = vpop.permute.xlu0 %752 }
 0x276   : > { %v3086_v24 = vpop.permute.xlu0 %728 }
 0x27a   : > { %v3088_v26 = vpop.permute.xlu0 %760 }
 0x27e   : > { %v3090_v27 = vpop.permute.xlu0 %768 }
 0x282   : > { %v3092_v29 = vpop.permute.xlu0 %776 }
 0x286   : > { %v3094_v30 = vpop.permute.xlu0 %784 }
 0x28a   : > { %v3096_v31 = vpop.permute.xlu0 %792 }
 0x28e   : > { %v525_v32 = vpop.permute.xlu0 %524 }
 0x28f   : > { %528 = vst.msk [vmem:[#allocation4] sm:$0xff] %vm527_vm2, %v525_v32 }
 0x29b   : > { %v887_v38 = vpop.f32.mrf.mxu0 }
 0x29c   : > { %v888_v39 = vadd.f32 %v2330_v37, %v887_v38 }
 0x29d   : > { %v2501_v40 = vpop.f32.mrf.mxu0 }
 0x29e   : > { %v894_v41 = vmul.f32 1.442695, %v888_v39  ;;  %vm893_vm5 = vcmp.gt.f32.partialorder %v888_v39, 20.0 }
 0x29f   : > { %v890_v42 = vpop.f32.mrf.mxu0 }
 0x2a0   : > { %2654 = vpow2.f32 %v894_v41  ;;  %v3147_v41 = vpop.permute.xlu1 %721 }
 0x2a1   : > { %v2502_v43 = vpop.f32.mrf.mxu0 }
 0x2ad   : > { %v2655_v46 = vpop.eup %2654 }
 0x2ae   : > { %v896_v47 = vadd.f32 1.0, %v2655_v46  ;;  %v899_v54 = vmul.f32 -0.5, %v2655_v46  ;;  %v902_v59 = vand.u32 2147483647, %v2655_v46 }
 0x2b0   : > { %2656 = vlog2.f32 %v896_v47  ;;  %v900_v57 = vadd.f32 1.0, %v899_v54  ;;  %vm903_vm4 = vcmp.lt.f32.partialorder %v902_v59, 0.0004427343  ;;  %v3156_v54 = vpop.permute.xlu1 %740 }
 0x2b1   : > { %2658 = vpow2.f32 %v412_v51 }
 0x2b2   : > { %2660 = vpow2.f32 %v414_v52  ;;  %v901_v3 = vmul.f32 %v2655_v46, %v900_v57 }
 0x2bd   : > { %v2657_v63 = vpop.eup %2656 }
 0x2be   : > { %v898_v2 = vmul.f32 0.6931472, %v2657_v63  ;;  %v2659_v32 = vpop.eup %2658 }
 0x2bf   : > { %v2661_v33 = vpop.eup %2660  ;;  %v3141_v36 = vsub.f32 0.0, %v2659_v32  ;;  %v3163_v32 = vpop.permute.xlu1 %748 }
 0x2c0   : > { %v904_v7 = vsel %vm903_vm4, %v901_v3, %v898_v2  ;;  %v3144_v38 = vsub.f32 0.0, %v2661_v33 }
 0x2c1   : > { %v905_v8 = vsel %vm893_vm5, %v888_v39, %v904_v7 }
 0x2c2   : > { %v914_v10 = vrot.slane %v905_v8, %v3135_v6  ;;  %v907_v17 = vcombine.high %v905_v8, %v905_v8 }
 0x2c4   : > { %v922_v34 = vcombine.high %v914_v10, %v914_v10  ;;  %v930_v35 = vrot.slane %v914_v10, %v3135_v6  ;;  %v921_v46 = vrot.slane %v907_v17, %v3135_v6 }
 0x2c6   : > { %v944_v37 = vrot.slane %v922_v34, %v3135_v6  ;;  %v959_v40 = vrot.slane %v930_v35, %v3008_v19  ;;  %v952_v39 = vcombine.high %v930_v35, %v930_v35  ;;  %v923_v56 = vcombine.high %v921_v46, %v921_v46 }
 0x2c7   : > { %v937_v57 = vrot.slane %v921_v46, %v3135_v6 }
 0x2c8   : > { %v963_v42 = vrot.slane %v944_v37, %v3008_v19  ;;  %v996_v43 = vmul.f32 %v959_v40, %v3141_v36  ;;  %v997_v47 = vmul.f32 %v959_v40, %v3144_v38  ;;  %v954_v48 = vcombine.high %v944_v37, %v944_v37  ;;  %v3167_v37 = vld [vmem:[#allocation3] sm:$0xff] }
 0x2c9   : > { %v967_v50 = vrot.slane %v952_v39, %v3008_v19  ;;  %v951_v10 = vrot.slane %v923_v56, %v3135_v6  ;;  %v975_v33 = vrot.slane %v937_v57, %v3008_v19  ;;  %v3171_v39 = vmul.f32 %v905_v8, %v3167_v37 }
 0x2ca   : > { %v998_v51 = vmul.f32 %v963_v42, %v3141_v36  ;;  %v999_v52 = vmul.f32 %v963_v42, %v3144_v38  ;;  %v1012_v55 = vmul.f32 1.442695, %v996_v43  ;;  %v1014_v58 = vmul.f32 1.442695, %v997_v47 }
 0x2cb   : > { %v971_v59 = vrot.slane %v954_v48, %v3008_v19  ;;  %v1000_v63 = vmul.f32 %v967_v50, %v3141_v36  ;;  %v1001_v3 = vmul.f32 %v967_v50, %v3144_v38  ;;  %v953_v42 = vcombine.high %v937_v57, %v937_v57 }
 0x2cc   : > { %2662 = vpow2.f32 %v1012_v55  ;;  %v1016_v2 = vmul.f32 1.442695, %v998_v51  ;;  %v1018_v7 = vmul.f32 1.442695, %v999_v52  ;;  %v979_v43 = vrot.slane %v951_v10, %v3008_v19  ;;  %v3176_v51 = vpop.permute.xlu1 %756 }
 0x2cd   : > { %2664 = vpow2.f32 %v1014_v58  ;;  %v1002_v34 = vmul.f32 %v971_v59, %v3141_v36  ;;  %v1020_v35 = vmul.f32 1.442695, %v1000_v63  ;;  %v1003_v17 = vmul.f32 %v971_v59, %v3144_v38 }
 0x2ce   : > { %2666 = vpow2.f32 %v1016_v2  ;;  %v1022_v40 = vmul.f32 1.442695, %v1001_v3  ;;  %v1004_v46 = vmul.f32 %v975_v33, %v3141_v36  ;;  %v1005_v48 = vmul.f32 %v975_v33, %v3144_v38 }
 0x2cf   : > { %2668 = vpow2.f32 %v1018_v7  ;;  %v1024_v47 = vmul.f32 1.442695, %v1002_v34  ;;  %v1026_v50 = vmul.f32 1.442695, %v1003_v17  ;;  %v955_v52 = vcombine.high %v951_v10, %v951_v10 }
 0x2d0   : > { %2670 = vpow2.f32 %v1020_v35  ;;  %v1050_v55 = vrot.slane %v3171_v39, %v3008_v19  ;;  %v983_v8 = vrot.slane %v953_v42, %v3008_v19  ;;  %v1006_v56 = vmul.f32 %v979_v43, %v3141_v36  ;;  %v3188_v17 = vpop.permute.xlu1 %732 }
 0x2d1   : > { %2672 = vpow2.f32 %v1022_v40  ;;  %v1028_v57 = vmul.f32 1.442695, %v1004_v46  ;;  %v1007_v59 = vmul.f32 %v979_v43, %v3144_v38  ;;  %v1030_v63 = vmul.f32 1.442695, %v1005_v48 }
 0x2d2   : > { %2674 = vpow2.f32 %v1024_v47  ;;  %v987_v3 = vrot.slane %v955_v52, %v3008_v19  ;;  %v1051_v10 = vmul.f32 %v1050_v55, %v3066_v11  ;;  %v1071_v33 = vrot.slane %v3171_v39, %v3014_v22 }
 0x2d3   : > { %2676 = vpow2.f32 %v1026_v50  ;;  %v1052_v35 = vmul.f32 %v1050_v55, %v3068_v12  ;;  %v1008_v40 = vmul.f32 %v983_v8, %v3141_v36  ;;  %v1032_v42 = vmul.f32 1.442695, %v1006_v56 }
 0x2d4   : > { %2678 = vpow2.f32 %v1028_v57  ;;  %v1009_v47 = vmul.f32 %v983_v8, %v3144_v38  ;;  %v1034_v48 = vmul.f32 1.442695, %v1007_v59  ;;  %v1010_v52 = vmul.f32 %v987_v3, %v3141_v36 }
 0x2d5   : > { %2680 = vpow2.f32 %v1030_v63  ;;  %v1092_v12 = vrot.slane %v3171_v39, %v3018_v25  ;;  %v1073_v57 = vmul.f32 %v1071_v33, %v3120_v45  ;;  %v1113_v56 = vrot.slane %v3171_v39, %v3022_v28 }
 0x2d6   : > { %v1011_v8 = vmul.f32 %v987_v3, %v3144_v38  ;;  %2682 = vpow2.f32 %v1032_v42  ;;  %v1036_v59 = vmul.f32 1.442695, %v1008_v40  ;;  %v1038_v36 = vmul.f32 1.442695, %v1009_v47 }
 0x2d7   : > { %2684 = vpow2.f32 %v1034_v48  ;;  %v1134_v45 = vrot.slane %v3171_v39, %v3048_v60  ;;  %v1094_v40 = vmul.f32 %v1092_v12, %v3125_v49  ;;  %v1114_v48 = vmul.f32 %v1113_v56, %v3072_v14 }
 0x2d8   : > { %2686 = vpow2.f32 %v1036_v59  ;;  %v1042_v42 = vmul.f32 1.442695, %v1011_v8 }
 0x2d9   : > { %v2663_v58 = vpop.eup %2662  ;;  %2688 = vpow2.f32 %v1038_v36 }
 0x2da   : > { %v2665_v2 = vpop.eup %2664  ;;  %v1045_v7 = vmul.f32 0.0, %v2663_v58 }
 0x2db   : > { %v1046_v34 = vmul.f32 0.0, %v2665_v2  ;;  %v2667_v46 = vpop.eup %2666  ;;  %v1072_v2 = vmul.f32 %v1071_v33, %v3118_v44  ;;  %v765_v44 = vpop.permute.xlu1 %764 }
 0x2dc   : > { %v1053_v43 = vadd.f32 %v1051_v10, %v1045_v7  ;;  %v2669_v11 = vpop.eup %2668 }
 0x2dd   : > { %v1054_v50 = vadd.f32 %v1052_v35, %v1046_v34  ;;  %v2671_v7 = vpop.eup %2670  ;;  %v1040_v35 = vmul.f32 1.442695, %v1010_v52 }
 0x2de   : > { %v1066_v58 = vmul.f32 %v2667_v46, %v1053_v43  ;;  %v2673_v34 = vpop.eup %2672  ;;  %v1055_v52 = vmul.f32 %v1053_v43, %v3080_v21  ;;  %v1155_v43 = vrot.slane %v3171_v39, %v3052_v62 }
 0x2df   : > { %v1067_v55 = vmul.f32 %v2669_v11, %v1054_v50  ;;  %v1093_v11 = vmul.f32 %v1092_v12, %v3070_v13  ;;  %v1056_v13 = vmul.f32 %v1054_v50, %v3156_v54  ;;  %2690 = vpow2.f32 %v1040_v35  ;;  %v773_v59 = vpop.permute.xlu1 %772 }
 0x2e0   : > { %v1074_v63 = vadd.f32 %v1072_v2, %v1066_v58  ;;  %v2675_v58 = vpop.eup %2674  ;;  %2692 = vpow2.f32 %v1042_v42  ;;  %v1197_v42 = vrot.slane %v3171_v39, %v3061_v5 }
 0x2e1   : > { %v1075_v10 = vadd.f32 %v1073_v57, %v1067_v55  ;;  %v2677_v55 = vpop.eup %2676  ;;  %v1115_v57 = vmul.f32 %v1113_v56, %v3130_v53  ;;  %v1058_v53 = vsel %vm527_vm2, %v1056_v13, 0.0 }
 0x2e2   : > { %v1087_v46 = vmul.f32 %v2671_v7, %v1074_v63  ;;  %v1076_v33 = vmul.f32 %v1074_v63, %v3082_v18  ;;  %v2679_v50 = vpop.eup %2678 }
 0x2e3   : > { %v1077_v38 = vmul.f32 %v1075_v10, %v3163_v32  ;;  %v1088_v3 = vmul.f32 %v2673_v34, %v1075_v10  ;;  %v2681_v7 = vpop.eup %2680  ;;  %v1135_v34 = vmul.f32 %v1134_v45, %v3074_v15  ;;  %v1156_v15 = vmul.f32 %v1155_v43, %v3076_v16 }
 0x2e4   : > { %v1095_v47 = vadd.f32 %v1093_v11, %v1087_v46  ;;  %v1078_v49 = vsel %vm527_vm2, %v1076_v33, 0.0  ;;  %v1136_v33 = vmul.f32 %v1134_v45, %v3132_v61 }
 0x2e5   : > { %v1096_v2 = vadd.f32 %v1094_v40, %v1088_v3  ;;  %v1079_v12 = vsel %vm527_vm2, %v1077_v38, 0.0  ;;  %v1176_v40 = vrot.slane %v3171_v39, %v3056_v0 }
 0x2e6   : > { %v1097_v18 = vmul.f32 %v1095_v47, %v3084_v23  ;;  %v1108_v32 = vmul.f32 %v2675_v58, %v1095_v47  ;;  %v1057_v23 = vsel %vm527_vm2, %v1055_v52, 0.0  ;;  %v1080_v36 = vadd.f32 %v1079_v12, %v1078_v49  ;;  %v2683_v47 = vpop.eup %2682  ;;  %v781_v52 = vpop.permute.xlu1 %780 }
 0x2e7   : > { %v1098_v14 = vmul.f32 %v1096_v2, %v3176_v51  ;;  %v1109_v8 = vmul.f32 %v2677_v55, %v1096_v2  ;;  %v1059_v38 = vadd.f32 %v1058_v53, %v1057_v23  ;;  %v1157_v2 = vmul.f32 %v1155_v43, %v3137_v9 }
 0x2e8   : > { %v1099_v21 = vsel %vm527_vm2, %v1097_v18, 0.0  ;;  %v1116_v54 = vadd.f32 %v1114_v48, %v1108_v32  ;;  %v1081_v13 = vrot.slane %v1080_v36, 4  ;;  %v1177_v12 = vmul.f32 %v1176_v40, %v3078_v20 }
 0x2e9   : > { %v1100_v56 = vsel %vm527_vm2, %v1098_v14, 0.0  ;;  %v1117_v63 = vadd.f32 %v1115_v57, %v1109_v8  ;;  %v1060_v39 = vrot.slane %v1059_v38, 4  ;;  %v1178_v14 = vmul.f32 %v1176_v40, %v3147_v41 }
 0x2ea   : > { %v1101_v51 = vadd.f32 %v1100_v56, %v1099_v21  ;;  %v1118_v10 = vmul.f32 %v1116_v54, %v3088_v26  ;;  %v1129_v46 = vmul.f32 %v2679_v50, %v1116_v54  ;;  %v1082_v9 = vadd.f32 %v1081_v13, %v1080_v36  ;;  %v789_v41 = vpop.permute.xlu1 %788 }
 0x2eb   : > { %v1119_v35 = vmul.f32 %v1117_v63, %v765_v44  ;;  %v1130_v11 = vmul.f32 %v2681_v7, %v1117_v63  ;;  %v2685_v44 = vpop.eup %2684 }
 0x2ec   : > { %v1120_v3 = vsel %vm527_vm2, %v1118_v10, 0.0  ;;  %v1137_v26 = vadd.f32 %v1135_v34, %v1129_v46  ;;  %v1102_v61 = vrot.slane %v1101_v51, 4  ;;  %v2687_v8 = vpop.eup %2686  ;;  %v1061_v10 = vadd.f32 %v1060_v39, %v1059_v38 }
 0x2ed   : > { %v1121_v48 = vsel %vm527_vm2, %v1119_v35, 0.0  ;;  %v1138_v58 = vadd.f32 %v1136_v33, %v1130_v11  ;;  %v2689_v23 = vpop.eup %2688  ;;  %v1199_v46 = vmul.f32 %v1197_v42, %v3188_v17 }
 0x2ee   : > { %v1122_v45 = vadd.f32 %v1121_v48, %v1120_v3  ;;  %v1139_v55 = vmul.f32 %v1137_v26, %v3090_v27  ;;  %v1150_v32 = vmul.f32 %v2683_v47, %v1137_v26  ;;  %v1103_v43 = vadd.f32 %v1102_v61, %v1101_v51  ;;  %v2691_v53 = vpop.eup %2690 }
 0x2ef   : > { %v1140_v18 = vmul.f32 %v1138_v58, %v773_v59  ;;  %v1151_v57 = vmul.f32 %v2685_v44, %v1138_v58  ;;  %v1198_v59 = vmul.f32 %v1197_v42, %v3086_v24  ;;  %v2693_v11 = vpop.eup %2692  ;;  %v1083_v24 = vrot.slane %v1082_v9, 2 }
 0x2f0   : > { %v1123_v49 = vrot.slane %v1122_v45, 4  ;;  %v1141_v16 = vsel %vm527_vm2, %v1139_v55, 0.0  ;;  %v1158_v54 = vadd.f32 %v1156_v15, %v1150_v32  ;;  %v1104_v40 = vrot.slane %v1103_v43, 2 }
 0x2f1   : > { %v1142_v21 = vsel %vm527_vm2, %v1140_v18, 0.0  ;;  %v1159_v50 = vadd.f32 %v1157_v2, %v1151_v57  ;;  %v1062_v15 = vrot.slane %v1061_v10, 2  ;;  %v797_v2 = vpop.permute.xlu1 %796  ;;  %v1084_v55 = vadd.f32 %v1083_v24, %v1082_v9 }
 0x2f2   : > { %v1143_v27 = vadd.f32 %v1142_v21, %v1141_v16  ;;  %v1160_v56 = vmul.f32 %v1158_v54, %v3092_v29  ;;  %v1171_v20 = vmul.f32 %v2687_v8, %v1158_v54  ;;  %v1124_v34 = vadd.f32 %v1123_v49, %v1122_v45 }
 0x2f3   : > { %v1161_v63 = vmul.f32 %v1159_v50, %v781_v52  ;;  %v1172_v7 = vmul.f32 %v2689_v23, %v1159_v50  ;;  %v1105_v57 = vadd.f32 %v1104_v40, %v1103_v43  ;;  %v1063_v49 = vadd.f32 %v1062_v15, %v1061_v10 }
 0x2f4   : > { %v1144_v35 = vrot.slane %v1143_v27, 4  ;;  %v1162_v33 = vsel %vm527_vm2, %v1160_v56, 0.0  ;;  %v1179_v51 = vadd.f32 %v1177_v12, %v1171_v20  ;;  %v1125_v44 = vrot.slane %v1124_v34, 2 }
 0x2f5   : > { %v1163_v36 = vsel %vm527_vm2, %v1161_v63, 0.0  ;;  %v1180_v3 = vadd.f32 %v1178_v14, %v1172_v7  ;;  %v1085_v50 = vrot.slane %v1084_v55, 1  ;;  %v1106_v9 = vrot.slane %v1105_v57, 1 }
 0x2f6   : > { %v1145_v47 = vadd.f32 %v1144_v35, %v1143_v27  ;;  %v1164_v29 = vadd.f32 %v1163_v36, %v1162_v33  ;;  %v1181_v48 = vmul.f32 %v1179_v51, %v3094_v30  ;;  %v1192_v58 = vmul.f32 %v2691_v53, %v1179_v51 }
 0x2f7   : > { %v1182_v26 = vmul.f32 %v1180_v3, %v789_v41  ;;  %v1193_v38 = vmul.f32 %v2693_v11, %v1180_v3  ;;  %v1126_v12 = vadd.f32 %v1125_v44, %v1124_v34  ;;  %v1064_v53 = vrot.slane %v1063_v49, 1 }
 0x2f8   : > { %v1146_v52 = vrot.slane %v1145_v47, 2  ;;  %v1165_v17 = vrot.slane %v1164_v29, 4  ;;  %v1183_v42 = vsel %vm527_vm2, %v1181_v48, 0.0  ;;  %v1200_v61 = vadd.f32 %v1198_v59, %v1192_v58 }
 0x2f9   : > { %v1184_v13 = vsel %vm527_vm2, %v1182_v26, 0.0  ;;  %v1201_v45 = vadd.f32 %v1199_v46, %v1193_v38  ;;  %v1127_v56 = vrot.slane %v1126_v12, 1  ;;  %v1086_v20 = vadd.f32 %v1085_v50, %v1084_v55 }
 0x2fa   : > { %v1166_v18 = vadd.f32 %v1165_v17, %v1164_v29  ;;  %v1185_v32 = vadd.f32 %v1184_v13, %v1183_v42  ;;  %v1202_v30 = vmul.f32 %v1200_v61, %v3096_v31  ;;  %v1147_v16 = vadd.f32 %v1146_v52, %v1145_v47  ;;  %v2339_v52 = vld [vmem:[%s3604_s8] ss:$0 sm:$0xff]  ;;  %v1238_v61 = vld [vmem:[#allocation4] sm:$0xff] }
 0x2fb   : > { %v1203_v39 = vmul.f32 %v1201_v45, %v797_v2  ;;  %v1107_v34 = vadd.f32 %v1106_v9, %v1105_v57  ;;  %v1065_v35 = vadd.f32 %v1064_v53, %v1063_v49  ;;  %v1128_v46 = vadd.f32 %v1127_v56, %v1126_v12  ;;  %v2628_v2 = vld [vmem:[%s3616_s1 + $0x18] sm:$0xff]   ;;  %v2632_v57 = vld [vmem:[%s3600_s4 + $0x28] sm:$0xff]   ;;  %v2637_v12 = vld [vmem:[%s3601_s5 + $0x60] sm:$0xff]  }
 0x2fc   : > { %v1167_v14 = vrot.slane %v1166_v18, 2  ;;  %v1186_v8 = vrot.slane %v1185_v32, 4  ;;  %v1204_v21 = vsel %vm527_vm2, %v1202_v30, 0.0  ;;  %v1148_v31 = vrot.slane %v1147_v16, 1  ;;  %v2634_v30 = vld [vmem:[%s3601_s5 + $0x78] sm:$0xff]   ;;  %v2636_v49 = vld [vmem:[%s3601_s5 + $0x68] sm:$0xff]  }
 0x2fd   : > { %v1205_v54 = vsel %vm527_vm2, %v1203_v39, 0.0  ;;  %v1214_v24 = vsel %vm1213_vm6, %v1065_v35, %v1086_v20  ;;  %v1236_v17 = vmul.f32 %v2339_v52, %v3167_v37  ;;  %v2630_v37 = vld [vmem:[%s3600_s4 + $0x38] sm:$0xff]   ;;  %v2635_v39 = vld [vmem:[%s3601_s5 + $0x70] sm:$0xff]   ;;  %v2347_v56 = vld [vmem:[%s3618_s2 + $0x4] sm:$0xf] }
 0x2fe   : > { %v1168_v23 = vadd.f32 %v1167_v14, %v1166_v18  ;;  %v1187_v27 = vadd.f32 %v1186_v8, %v1185_v32  ;;  %v1206_v59 = vadd.f32 %v1205_v54, %v1204_v21  ;;  %v1149_v36 = vadd.f32 %v1148_v31, %v1147_v16  ;;  %v2629_v18 = vld [vmem:[%s3616_s1 + $0x10] sm:$0xff]   ;;  %2524 = vmatpush3.bf16.msra.mxu0 %v2630_v37  ;;  %v2638_v14 = vld [vmem:[%s3601_s5 + $0x58] sm:$0xff]   ;;  %v2640_v16 = vld [vmem:[%s3601_s5 + $0x48] sm:$0xff]  }
 0x2ff   : > { %v1216_v47 = vsel %vm1215_vm7, %v1214_v24, %v1107_v34  ;;  %v2631_v32 = vld [vmem:[%s3600_s4 + $0x30] sm:$0xff]   ;;  %2525 = vmatprep.subr.bf16.mxu0 %v2807_v1  ;;  %v2744_v54 = vld [vmem:[%s2943_s29] sm:$0xff]  ;;  %v1456_v20 = vrot.slane %v2347_v56, %v3014_v22  ;;  %v1463_v35 = vrot.slane %v2347_v56, %v3018_v25  ;;  %s2416_s29 = sshll.u32 %s2898_s25, 7  ;;  %s2751_s25 = scalar_lea.vmem %s2750_s19, 256 }
 0x300   : > { %v1188_v43 = vrot.slane %v1187_v27, 2  ;;  %v1207_v63 = vrot.slane %v1206_v59, 4  ;;  %v1169_v7 = vrot.slane %v1168_v23, 1  ;;  %v1218_v48 = vsel %vm1217_vm8, %v1216_v47, %v1128_v46  ;;  %v2639_v8 = vld [vmem:[%s3601_s5 + $0x50] sm:$0xff]   ;;  %v2641_v52 = vld [vmem:[%s3601_s5 + $0x40] sm:$0xff]   ;;  %s2252_s2 = scalar_lea.hbm %s3608_s12, %s2416_s29 }
 0x301   : > { %v1220_v26 = vsel %vm1219_vm9, %v1218_v48, %v1149_v36  ;;  %v1470_v36 = vrot.slane %v2347_v56, %v3022_v28 }
 0x302   : > { %v1189_v41 = vadd.f32 %v1188_v43, %v1187_v27  ;;  %v1208_v10 = vadd.f32 %v1207_v63, %v1206_v59  ;;  %v1170_v51 = vadd.f32 %v1169_v7, %v1168_v23  ;;  %2526 = vmatpush3.bf16.msra.mxu0 %v2631_v32  ;;  %v1443_v63 = vrot.slane %v2347_v56, %v3008_v19  ;;  %v2391_v7 = vld [vmem:[%s3619_s3 + $0x1] ss:$0 sm:$0xff]  ;;  %s2241_s3 = scalar_lea.sflag [#allocation9], %s402_s17 }
 0x303   : > { %2527 = vmatprep.subr.bf16.mxu0 %v2807_v1 }
 0x304   : > { %v1190_v11 = vrot.slane %v1189_v41, 1  ;;  %v1209_v33 = vrot.slane %v1208_v10, 2  ;;  %v1222_v38 = vsel %vm1221_vm10, %v1220_v26, %v1170_v51 }
 0x306   : > { %v1210_v3 = vadd.f32 %v1209_v33, %v1208_v10  ;;  %v1191_v40 = vadd.f32 %v1190_v11, %v1189_v41  ;;  %2528 = vmatpush3.bf16.msra.mxu0 %v2632_v57 }
 0x307   : > { %2529 = vmatprep.subr.bf16.mxu0 %v2807_v1 }
 0x308   : > { %v1211_v29 = vrot.slane %v1210_v3, 1  ;;  %v1224_v15 = vsel %vm1223_vm11, %v1222_v38, %v1191_v40 }
 0x30a   : > { %v1212_v58 = vadd.f32 %v1211_v29, %v1210_v3 }
 0x30c   : > { %v1226_v44 = vsel %vm1225_vm12, %v1224_v15, %v1212_v58 }
 0x30d   : > { %1227 = vst.msk [vmem:[#allocation5] sm:$0xff] %vm527_vm2, %v1226_v44 }
 0x314   : > { %v1228_v42 = vld [vmem:[#allocation5] sm:$0xff] }
 0x315   : > { %v1237_v13 = vadd.f32 %v1236_v17, %v1228_v42 }
 0x317   : > { %v1239_v45 = vmul.f32 %v1238_v61, %v1237_v13 }
 0x319   : > { %v1240_v55 = vpack.c.bf16 %v1239_v45, %v1239_v45 }
 0x31b   : > { %2512 = vmatmul.mubr.msk.bf16.vlgmr.msra.gmra.mxu1 %vm527_vm2, %v1240_v55 }
 0x31c   : > { %2516 = vmatpush3.bf16.msra.mxu1 %v2628_v2  ;;  %2519 = vmatprep.mubr.msk.bf16.mxu1 %vm2808_vm0, %v2807_v1 }
 0x31d   : > { %2517 = vmatprep.subr.bf16.mxu1 %v2807_v1 }
 0x320   : > { %2518 = vmatpush3.bf16.msra.mxu1 %v2629_v18 }
 0x321   : > { %2535 = vmatprep.subr.bf16.mxu1 %v2807_v1 }
 0x323   : > { %2520 = vmatmul.mubr.msk.bf16.vlgmr.msra.gmra.mxu1 %vm472_vm1, %v2947_v4  ;;  %v2633_v4 = vld [vmem:[%s3600_s4 + $0x20] sm:$0xff]  }
 0x324   : > { %2551 = vmatprep.mubr.msk.bf16.mxu1 %vm2808_vm0, %v2807_v1  ;;  %2530 = vmatpush3.bf16.msra.mxu0 %v2633_v4 }
 0x325   : > { %2555 = vmatprep.subr.bf16.mxu0 %v2807_v1  ;;  %2536 = vmatpush3.bf16.msra.mxu1 %v2634_v30 }
 0x326   : > { %2537 = vmatprep.subr.bf16.mxu1 %v2807_v1 }
 0x329   : > { %2538 = vmatpush3.bf16.msra.mxu1 %v2635_v39 }
 0x32a   : > { %2539 = vmatprep.subr.bf16.mxu1 %v2807_v1 }
 0x32d   : > { %2540 = vmatpush3.bf16.msra.mxu1 %v2636_v49 }
 0x32e   : > { %2541 = vmatprep.subr.bf16.mxu1 %v2807_v1 }
 0x331   : > { %2542 = vmatpush3.bf16.msra.mxu1 %v2637_v12 }
 0x332   : > { %2543 = vmatprep.subr.bf16.mxu1 %v2807_v1 }
 0x335   : > { %2544 = vmatpush3.bf16.msra.mxu1 %v2638_v14 }
 0x336   : > { %2545 = vmatprep.subr.bf16.mxu1 %v2807_v1 }
 0x339   : > { %2546 = vmatpush3.bf16.msra.mxu1 %v2639_v8 }
 0x33a   : > { %2547 = vmatprep.subr.bf16.mxu1 %v2807_v1 }
 0x33d   : > { %2548 = vmatpush3.bf16.msra.mxu1 %v2640_v16 }
 0x33e   : > { %2549 = vmatprep.subr.bf16.mxu1 %v2807_v1 }
 0x341   : > { %2550 = vmatpush3.bf16.msra.mxu1 %v2641_v52 }
 0x3db   : > { %v1302_v21 = vpop.f32.mrf.mxu1 }
 0x3dc   : > { %v1308_v50 = vadd.f32 %v2744_v54, %v1302_v21 }
 0x3dd   : > { %v2513_v23 = vpop.f32.mrf.mxu1 }
 0x3de   : > { %1309 = vst.msk [vmem:[#allocation7] sm:$0xff] %vm472_vm1, %v1308_v50 }
 0x3df   : > { %v1305_v27 = vpop.f32.mrf.mxu1 }
 0x3e1   : > { %v2514_v59 = vpop.f32.mrf.mxu1 }
 0x3e3   : > { %v3320_v9 = vpop.f32.mrf.mxu1 }
 0x3e4   : > { %1436 = vst.msk [vmem:[#allocation2] sm:$0xff] %vm527_vm2, %v3320_v9  ;;  %v2390_v30 = vmul.f32 -1.442695, %v3320_v9 }
 0x3e5   : > { %v2521_v53 = vpop.f32.mrf.mxu1 }
 0x3e7   : > { %v1421_v43 = vpop.f32.mrf.mxu1 }
 0x3e9   : > { %v2522_v31 = vpop.f32.mrf.mxu1 }
 0x3eb   : > { %v1439_v41 = vld [vmem:[#allocation2 + $0x3] sm:$0xff] }
 0x3ec   : > { %v1452_v10 = vld [vmem:[#allocation2 + $0x2] sm:$0xff]  ;;  %v1444_v34 = vmul.f32 %v1443_v63, %v1439_v41 }
 0x3ed   : > { %v1459_v46 = vld [vmem:[#allocation2 + $0x1] sm:$0xff]  ;;  %v1457_v33 = vmul.f32 %v1456_v20, %v1452_v10 }
 0x3ee   : > { %v1451_v11 = vadd.f32 %v2391_v7, %v1444_v34  ;;  %v1466_v51 = vld [vmem:[#allocation2] sm:$0xff]  ;;  %v1464_v24 = vmul.f32 %v1463_v35, %v1459_v46 }
 0x3ef   : > { %v1471_v47 = vmul.f32 %v1470_v36, %v1466_v51  ;;  %v2398_v34 = vld [vmem:[%s3602_s6 + $0x1] ss:$0 sm:$0xff] }
 0x3f0   : > { %v1458_v3 = vadd.f32 %v1457_v33, %v1451_v11 }
 0x3f2   : > { %v1465_v40 = vadd.f32 %v1464_v24, %v1458_v3  ;;  %v2642_v3 = vld [vmem:[%s3605_s9 + $0x38] sm:$0xff]  }
 0x3f4   : > { %v1472_v29 = vadd.f32 %v1471_v47, %v1465_v40  ;;  %v2643_v40 = vld [vmem:[%s3605_s9 + $0x30] sm:$0xff]   ;;  %v2644_v47 = vld [vmem:[%s3605_s9 + $0x28] sm:$0xff]  }
 0x3f6   : > { %v2392_v48 = vmul.f32 -1.442695, %v1472_v29 }
 0x3f8   : > { %2694 = vpow2.f32 %v2392_v48 }
 0x405   : > { %v2695_v26 = vpop.eup %2694 }
 0x406   : > { %v1476_v58 = vadd.f32 1.0, %v2695_v26 }
 0x408   : > { %2696 = vrcp.f32 %v1476_v58  ;;  %v2645_v58 = vld [vmem:[%s3605_s9 + $0x20] sm:$0xff]  }
 0x409   : > { %2698 = vpow2.f32 %v2390_v30 }
 0x415   : > { %v2697_v38 = vpop.eup %2696 }
 0x416   : > { %v1479_v15 = vmul.f32 %v2697_v38, %v1472_v29  ;;  %v2699_v49 = vpop.eup %2698 }
 0x417   : > { %v1427_v12 = vadd.f32 1.0, %v2699_v49 }
 0x418   : > { %1480 = vst.msk [vmem:[#allocation3] sm:$0xff] %vm527_vm2, %v1479_v15  ;;  %v1481_v44 = vpack.c.bf16 %v1479_v15, %v1479_v15 }
 0x419   : > { %2700 = vrcp.f32 %v1427_v12 }
 0x41a   : > { %2532 = vmatmul.mubr.msk.bf16.vlgmr.msra.gmra.mxu0 %vm527_vm2, %v1481_v44 }
 0x41b   : > { %2563 = vmatprep.mubr.msk.bf16.mxu0 %vm2808_vm0, %v2807_v1  ;;  %2556 = vmatpush3.bf16.msra.mxu0 %v2642_v3 }
 0x41c   : > { %2557 = vmatprep.subr.bf16.mxu0 %v2807_v1 }
 0x41f   : > { %2558 = vmatpush3.bf16.msra.mxu0 %v2643_v40 }
 0x420   : > { %2559 = vmatprep.subr.bf16.mxu0 %v2807_v1 }
 0x423   : > { %2560 = vmatpush3.bf16.msra.mxu0 %v2644_v47 }
 0x424   : > { %2561 = vmatprep.subr.bf16.mxu0 %v2807_v1 }
 0x426   : > { %v2701_v14 = vpop.eup %2700 }
 0x427   : > { %v1430_v8 = vmul.f32 %v2701_v14, %v3320_v9  ;;  %2562 = vmatpush3.bf16.msra.mxu0 %v2645_v58 }
 0x4da   : > { %v1543_v17 = vpop.f32.mrf.mxu0 }
 0x4db   : > { %v1704_v42 = vpack.c.bf16 %v1543_v17, %v1543_v17  ;;  %v1632_v13 = vrot.slane %v1543_v17, %v3061_v5  ;;  %v1621_v2 = vrot.slane %v1543_v17, %v3056_v0  ;;  %v1610_v18 = vrot.slane %v1543_v17, %v3052_v62 }
 0x4dc   : > { %v2533_v61 = vpop.f32.mrf.mxu0  ;;  %v1599_v37 = vrot.slane %v1543_v17, %v3048_v60  ;;  %v1588_v32 = vrot.slane %v1543_v17, %v3022_v28  ;;  %v1577_v57 = vrot.slane %v1543_v17, %v3018_v25  ;;  %v1566_v4 = vrot.slane %v1543_v17, %v3014_v22 }
 0x4dd   : > { %2552 = vmatmul.mubr.bf16.vlgmr.msra.gmra.mxu1 %v1704_v42  ;;  %1638 = vbcast.lane.b32.xlu0 %v1632_v13, 264  ;;  %v1555_v39 = vrot.slane %v1543_v17, %v3008_v19  ;;  %v2346_v61 = vld [vmem:[%s3603_s7 + $0x18] sm:$0xff] }
 0x4de   : > { %1634 = vbcast.lane.b32.xlu1 %v1632_v13, 256  ;;  %v1546_v45 = vpop.f32.mrf.mxu0 }
 0x4e0   : > { %v2534_v55 = vpop.f32.mrf.mxu0 }
 0x4e1   : > { %1627 = vbcast.lane.b32.xlu0 %v1621_v2, 264 }
 0x4e2   : > { %1623 = vbcast.lane.b32.xlu1 %v1621_v2, 256 }
 0x4e5   : > { %1616 = vbcast.lane.b32.xlu0 %v1610_v18, 264 }
 0x4e6   : > { %1612 = vbcast.lane.b32.xlu1 %v1610_v18, 256 }
 0x4e9   : > { %1605 = vbcast.lane.b32.xlu0 %v1599_v37, 264 }
 0x4ea   : > { %1601 = vbcast.lane.b32.xlu1 %v1599_v37, 256 }
 0x4ed   : > { %1594 = vbcast.lane.b32.xlu0 %v1588_v32, 264 }
 0x4ee   : > { %1590 = vbcast.lane.b32.xlu1 %v1588_v32, 256 }
 0x4f1   : > { %1583 = vbcast.lane.b32.xlu0 %v1577_v57, 264 }
 0x4f2   : > { %1579 = vbcast.lane.b32.xlu1 %v1577_v57, 256 }
 0x4f5   : > { %1572 = vbcast.lane.b32.xlu0 %v1566_v4, 264 }
 0x4f6   : > { %1568 = vbcast.lane.b32.xlu1 %v1566_v4, 256 }
 0x4f9   : > { %1561 = vbcast.lane.b32.xlu0 %v1555_v39, 264 }
 0x4fa   : > { %1557 = vbcast.lane.b32.xlu1 %v1555_v39, 256 }
 0x4fd   : > { %1646 = vbcast.lane.b32.xlu0 %v1555_v39, 280 }
 0x4fe   : > { %1642 = vbcast.lane.b32.xlu1 %v1555_v39, 272 }
 0x501   : > { %1654 = vbcast.lane.b32.xlu0 %v1566_v4, 280 }
 0x502   : > { %1650 = vbcast.lane.b32.xlu1 %v1566_v4, 272 }
 0x505   : > { %1662 = vbcast.lane.b32.xlu0 %v1577_v57, 280 }
 0x506   : > { %1658 = vbcast.lane.b32.xlu1 %v1577_v57, 272 }
 0x509   : > { %1670 = vbcast.lane.b32.xlu0 %v1588_v32, 280 }
 0x50a   : > { %1666 = vbcast.lane.b32.xlu1 %v1588_v32, 272 }
 0x50d   : > { %1678 = vbcast.lane.b32.xlu0 %v1599_v37, 280 }
 0x50e   : > { %1674 = vbcast.lane.b32.xlu1 %v1599_v37, 272  ;;  %v1315_v37 = vmul.f32 1.442695, %v2346_v61 }
 0x511   : > { %1686 = vbcast.lane.b32.xlu0 %v1610_v18, 280 }
 0x512   : > { %1682 = vbcast.lane.b32.xlu1 %v1610_v18, 272 }
 0x515   : > { %1694 = vbcast.lane.b32.xlu0 %v1621_v2, 280 }
 0x516   : > { %1690 = vbcast.lane.b32.xlu1 %v1621_v2, 272 }
 0x519   : > { %1702 = vbcast.lane.b32.xlu0 %v1632_v13, 280 }
 0x51a   : > { %1698 = vbcast.lane.b32.xlu1 %v1632_v13, 272  ;;  %v2345_v13 = vld [vmem:[%s3603_s7 + $0x10] sm:$0xff] }
 0x51b   : > { %v1313_v55 = vmul.f32 1.442695, %v2345_v13 }
 0x51e   : > { %1432 = vrot.lane.b32.xlu1 %v1430_v8, %s3620_s18  ;;  %s2317_s18 = sshll.u32 %s402_s17, 3 }
 0x51f   : > { %s404_s15 = scalar_lea.vmem [#allocation8], %s2317_s18 }
 0x520   : > { %s2254_s16 = sshll.u32 %s404_s15, 4  ;;  %s2255_s16 = int_to_ptr.vmem [resolvable:$true] %s2254_s16 }
 0x521   : > { %s2745_s20 = scalar_lea.vmem %s2255_s16, 128  ;;  %p2752_p0 = scmp.lt.s32.totalorder %s2255_s16, %s2750_s19 }
 0x522   : > { %p2746_p11 = scmp.ne.s32.totalorder %s2255_s16, %s2745_s20  ;;  %p2753_p1 = scmp.lt.s32.totalorder %s2751_s25, %s2745_s20 }
 0x524   : > { %p2747_p12 = pnand %p2746_p11, %p2915_p5  ;;  %p2754_p2 = por %p2753_p1, %p2752_p0 }
 0x526   : > { %p2748_p13 = pneg %p2747_p12 }
 0x528   : > { %p2755_p3 = pnand %p2754_p2, %p2748_p13 }
 0x54f   : > { %v3391_v24 = vpop.permute.xlu0 %1638 }
 0x550   : > { %v3352_v16 = vpop.permute.xlu1 %1634 }
 0x553   : > { %v3401_v48 = vpop.permute.xlu0 %1627 }
 0x554   : > { %v3354_v21 = vpop.permute.xlu1 %1623 }
 0x557   : > { %v3407_v38 = vpop.permute.xlu0 %1616 }
 0x558   : > { %v3356_v54 = vpop.permute.xlu1 %1612 }
 0x55b   : > { %v3409_v44 = vpop.permute.xlu0 %1605 }
 0x55c   : > { %v3358_v50 = vpop.permute.xlu1 %1601 }
 0x55f   : > { %v3417_v1 = vpop.permute.xlu0 %1594 }
 0x560   : > { %v3360_v23 = vpop.permute.xlu1 %1590 }
 0x563   : > { %v3420_v30 = vpop.permute.xlu0 %1583 }
 0x564   : > { %v3362_v27 = vpop.permute.xlu1 %1579 }
 0x567   : > { %v3423_v12 = vpop.permute.xlu0 %1572 }
 0x568   : > { %v3364_v59 = vpop.permute.xlu1 %1568 }
 0x56c   : > { %v3366_v53 = vpop.permute.xlu1 %1557 }
 0x570   : > { %v3368_v56 = vpop.permute.xlu1 %1642 }
 0x574   : > { %v3370_v9 = vpop.permute.xlu1 %1650 }
 0x578   : > { %v3372_v43 = vpop.permute.xlu1 %1658 }
 0x57c   : > { %v3374_v63 = vpop.permute.xlu1 %1666 }
 0x580   : > { %v3376_v31 = vpop.permute.xlu1 %1674 }
 0x584   : > { %v3378_v20 = vpop.permute.xlu1 %1682 }
 0x588   : > { %v3380_v7 = vpop.permute.xlu1 %1690 }
 0x58c   : > { %v3382_v41 = vpop.permute.xlu1 %1698 }
 0x590   : > { %v1433_v10 = vpop.permute.xlu1 %1432 }
 0x591   : > { %1435 = vst.msk [vmem:[#allocation4] sm:$0xff] %vm527_vm2, %v1433_v10 }
 0x59d   : > { %v1793_v35 = vpop.f32.mrf.mxu1 }
 0x59e   : > { %v1794_v46 = vadd.f32 %v2398_v34, %v1793_v35  ;;  %v3426_v34 = vpop.permute.xlu0 %1561 }
 0x59f   : > { %v2553_v11 = vpop.f32.mrf.mxu1 }
 0x5a0   : > { %v1800_v33 = vmul.f32 1.442695, %v1794_v46  ;;  %vm1799_vm14 = vcmp.gt.f32.partialorder %v1794_v46, 20.0 }
 0x5a1   : > { %v1796_v36 = vpop.f32.mrf.mxu1 }
 0x5a2   : > { %2702 = vpow2.f32 %v1800_v33 }
 0x5a3   : > { %v2554_v51 = vpop.f32.mrf.mxu1 }
 0x5af   : > { %v2703_v29 = vpop.eup %2702 }
 0x5b0   : > { %v1802_v26 = vadd.f32 1.0, %v2703_v29  ;;  %v1805_v15 = vmul.f32 -0.5, %v2703_v29  ;;  %v1808_v17 = vand.u32 2147483647, %v2703_v29 }
 0x5b2   : > { %2704 = vlog2.f32 %v1802_v26  ;;  %v1806_v52 = vadd.f32 1.0, %v1805_v15  ;;  %vm1809_vm13 = vcmp.lt.f32.partialorder %v1808_v17, 0.0004427343 }
 0x5b3   : > { %2706 = vpow2.f32 %v1313_v55 }
 0x5b4   : > { %v1807_v2 = vmul.f32 %v2703_v29, %v1806_v52  ;;  %2708 = vpow2.f32 %v1315_v37  ;;  %v3436_v29 = vpop.permute.xlu0 %1646 }
 0x5b8   : > { %v3443_v61 = vpop.permute.xlu0 %1654 }
 0x5bf   : > { %v2705_v42 = vpop.eup %2704 }
 0x5c0   : > { %v1804_v45 = vmul.f32 0.6931472, %v2705_v42  ;;  %v2707_v10 = vpop.eup %2706 }
 0x5c1   : > { %v3430_v36 = vsub.f32 0.0, %v2707_v10 }
 0x5c2   : > { %v1810_v18 = vsel %vm1809_vm13, %v1807_v2, %v1804_v45 }
 0x5c3   : > { %v1811_v32 = vsel %vm1799_vm14, %v1794_v46, %v1810_v18  ;;  %v2709_v46 = vpop.eup %2708 }
 0x5c4   : > { %v1813_v57 = vcombine.high %v1811_v32, %v1811_v32  ;;  %v1820_v35 = vrot.slane %v1811_v32, %v3135_v6  ;;  %v3432_v51 = vsub.f32 0.0, %v2709_v46  ;;  %v3451_v46 = vpop.permute.xlu0 %1662 }
 0x5c6   : > { %v1827_v4 = vrot.slane %v1813_v57, %v3135_v6  ;;  %v1828_v3 = vcombine.high %v1820_v35, %v1820_v35  ;;  %v1836_v45 = vrot.slane %v1820_v35, %v3135_v6 }
 0x5c8   : > { %v1829_v39 = vcombine.high %v1827_v4, %v1827_v4  ;;  %v1843_v14 = vrot.slane %v1827_v4, %v3135_v6  ;;  %v1850_v58 = vrot.slane %v1828_v3, %v3135_v6 }
 0x5ca   : > { %v1857_v49 = vrot.slane %v1829_v39, %v3135_v6  ;;  %v1859_v11 = vcombine.high %v1843_v14, %v1843_v14  ;;  %v1860_v2 = vcombine.high %v1850_v58, %v1850_v58  ;;  %v1881_v55 = vrot.slane %v1843_v14, %v3008_v19  ;;  %v3453_v6 = vld [vmem:[#allocation3] sm:$0xff] }
 0x5cb   : > { %v1858_v39 = vcombine.high %v1836_v45, %v1836_v45 }
 0x5cc   : > { %v1861_v8 = vcombine.high %v1857_v49, %v1857_v49  ;;  %v1889_v40 = vrot.slane %v1859_v11, %v3008_v19  ;;  %v1885_v15 = vrot.slane %v1857_v49, %v3008_v19  ;;  %v1877_v49 = vrot.slane %v1860_v2, %v3008_v19 }
 0x5cd   : > { %v1911_v14 = vmul.f32 %v1881_v55, %v3432_v51  ;;  %v3457_v11 = vmul.f32 %v1811_v32, %v3453_v6 }
 0x5ce   : > { %v1893_v33 = vrot.slane %v1861_v8, %v3008_v19  ;;  %v1914_v52 = vmul.f32 %v1889_v40, %v3430_v36  ;;  %v1915_v42 = vmul.f32 %v1889_v40, %v3432_v51  ;;  %v1912_v18 = vmul.f32 %v1885_v15, %v3430_v36 }
 0x5cf   : > { %v1913_v57 = vmul.f32 %v1885_v15, %v3432_v51  ;;  %v1910_v8 = vmul.f32 %v1881_v55, %v3430_v36  ;;  %v1908_v3 = vmul.f32 %v1877_v49, %v3430_v36  ;;  %v1956_v15 = vrot.slane %v3457_v11, %v3061_v5 }
 0x5d0   : > { %v1916_v47 = vmul.f32 %v1893_v33, %v3430_v36  ;;  %v1917_v26 = vmul.f32 %v1893_v33, %v3432_v51  ;;  %v1942_v37 = vmul.f32 1.442695, %v1914_v52  ;;  %v1944_v4 = vmul.f32 1.442695, %v1915_v42  ;;  %v3464_v52 = vpop.permute.xlu0 %1670 }
 0x5d1   : > { %v1938_v10 = vmul.f32 1.442695, %v1912_v18  ;;  %v1940_v35 = vmul.f32 1.442695, %v1913_v57  ;;  %v1873_v33 = vrot.slane %v1858_v39, %v3008_v19  ;;  %v1934_v40 = vmul.f32 1.442695, %v1910_v8 }
 0x5d2   : > { %v1946_v17 = vmul.f32 1.442695, %v1916_v47  ;;  %v1948_v13 = vmul.f32 1.442695, %v1917_v26  ;;  %v1909_v47 = vmul.f32 %v1877_v49, %v3432_v51  ;;  %v1936_v26 = vmul.f32 1.442695, %v1911_v14 }
 0x5d3   : > { %v1906_v32 = vmul.f32 %v1873_v33, %v3430_v36  ;;  %v1930_v42 = vmul.f32 1.442695, %v1908_v3  ;;  %v1907_v2 = vmul.f32 %v1873_v33, %v3432_v51  ;;  %v1957_v57 = vmul.f32 %v1956_v15, %v3352_v16 }
 0x5d4   : > { %2710 = vpow2.f32 %v1946_v17  ;;  %v1869_v17 = vrot.slane %v1850_v58, %v3008_v19  ;;  %v1932_v55 = vmul.f32 1.442695, %v1909_v47  ;;  %v1977_v5 = vrot.slane %v3457_v11, %v3056_v0 }
 0x5d5   : > { %2712 = vpow2.f32 %v1948_v13  ;;  %v1958_v58 = vmul.f32 %v1956_v15, %v3391_v24  ;;  %v1926_v8 = vmul.f32 1.442695, %v1906_v32  ;;  %v1928_v3 = vmul.f32 1.442695, %v1907_v2 }
 0x5d6   : > { %2714 = vpow2.f32 %v1942_v37  ;;  %v1904_v49 = vmul.f32 %v1869_v17, %v3430_v36  ;;  %v1905_v33 = vmul.f32 %v1869_v17, %v3432_v51  ;;  %v1998_v24 = vrot.slane %v3457_v11, %v3052_v62 }
 0x5d7   : > { %2716 = vpow2.f32 %v1944_v4  ;;  %v1865_v4 = vrot.slane %v1836_v45, %v3008_v19  ;;  %v2019_v62 = vrot.slane %v3457_v11, %v3048_v60 }
 0x5d8   : > { %2718 = vpow2.f32 %v1938_v10  ;;  %v1922_v32 = vmul.f32 1.442695, %v1904_v49  ;;  %v1924_v2 = vmul.f32 1.442695, %v1905_v33 }
 0x5d9   : > { %2720 = vpow2.f32 %v1940_v35  ;;  %v1679_v35 = vpop.permute.xlu0 %1678  ;;  %v1902_v15 = vmul.f32 %v1865_v4, %v3430_v36  ;;  %v2000_v36 = vmul.f32 %v1998_v24, %v3407_v38  ;;  %v2021_v60 = vmul.f32 %v2019_v62, %v3409_v44 }
 0x5da   : > { %2722 = vpow2.f32 %v1934_v40  ;;  %v1978_v40 = vmul.f32 %v1977_v5, %v3354_v21  ;;  %v2061_v38 = vrot.slane %v3457_v11, %v3018_v25 }
 0x5db   : > { %2724 = vpow2.f32 %v1936_v26  ;;  %v1979_v26 = vmul.f32 %v1977_v5, %v3401_v48  ;;  %v1918_v5 = vmul.f32 1.442695, %v1902_v15 }
 0x5dc   : > { %2726 = vpow2.f32 %v1930_v42  ;;  %v2062_v25 = vmul.f32 %v2061_v38, %v3362_v27 }
 0x5dd   : > { %2728 = vpow2.f32 %v1932_v55 }
 0x5de   : > { %2730 = vpow2.f32 %v1926_v8 }
 0x5df   : > { %2732 = vpow2.f32 %v1928_v3 }
 0x5e0   : > { %2734 = vpow2.f32 %v1922_v32 }
 0x5e1   : > { %v2711_v13 = vpop.eup %2710  ;;  %2736 = vpow2.f32 %v1924_v2 }
 0x5e2   : > { %v2713_v18 = vpop.eup %2712  ;;  %v1951_v37 = vmul.f32 0.0, %v2711_v13  ;;  %v1903_v13 = vmul.f32 %v1865_v4, %v3432_v51  ;;  %2738 = vpow2.f32 %v1918_v5 }
 0x5e3   : > { %v1952_v39 = vmul.f32 0.0, %v2713_v18  ;;  %v2715_v14 = vpop.eup %2714 }
 0x5e4   : > { %v3475_v10 = vadd.f32 %v1957_v57, %v1951_v37  ;;  %v2717_v0 = vpop.eup %2716  ;;  %v1999_v37 = vmul.f32 %v1998_v24, %v3356_v54  ;;  %v1687_v57 = vpop.permute.xlu0 %1686  ;;  %v1920_v49 = vmul.f32 1.442695, %v1903_v13  ;;  %v2040_v54 = vrot.slane %v3457_v11, %v3022_v28 }
 0x5e5   : > { %v3478_v16 = vadd.f32 %v1958_v58, %v1952_v39  ;;  %v2719_v42 = vpop.eup %2718 }
 0x5e6   : > { %v1972_v45 = vmul.f32 %v2715_v14, %v3475_v10  ;;  %v2721_v18 = vpop.eup %2720  ;;  %v2020_v14 = vmul.f32 %v2019_v62, %v3358_v50  ;;  %2740 = vpow2.f32 %v1920_v49  ;;  %v2103_v50 = vrot.slane %v3457_v11, %v3008_v19 }
 0x5e7   : > { %v1973_v47 = vmul.f32 %v2717_v0, %v3478_v16  ;;  %v2723_v58 = vpop.eup %2722  ;;  %v2082_v0 = vrot.slane %v3457_v11, %v3014_v22  ;;  %v2041_v28 = vmul.f32 %v2040_v54, %v3360_v23  ;;  %v2042_v15 = vmul.f32 %v2040_v54, %v3417_v1 }
 0x5e8   : > { %v1980_v17 = vadd.f32 %v1978_v40, %v1972_v45  ;;  %v2725_v4 = vpop.eup %2724  ;;  %v1695_v40 = vpop.permute.xlu0 %1694  ;;  %v2063_v22 = vmul.f32 %v2061_v38, %v3420_v30  ;;  %v2104_v23 = vmul.f32 %v2103_v50, %v3366_v53 }
 0x5e9   : > { %v1981_v55 = vadd.f32 %v1979_v26, %v1973_v47  ;;  %v2727_v45 = vpop.eup %2726  ;;  %v2083_v13 = vmul.f32 %v2082_v0, %v3364_v59  ;;  %v2084_v19 = vmul.f32 %v2082_v0, %v3423_v12 }
 0x5ea   : > { %v1993_v21 = vmul.f32 %v2719_v42, %v1980_v17  ;;  %v2729_v47 = vpop.eup %2728 }
 0x5eb   : > { %v1994_v48 = vmul.f32 %v2721_v18, %v1981_v55  ;;  %v2731_v2 = vpop.eup %2730  ;;  %v1983_v1 = vmul.f32 %v1981_v55, %v1695_v40 }
 0x5ec   : > { %v2001_v39 = vadd.f32 %v1999_v37, %v1993_v21  ;;  %v2733_v11 = vpop.eup %2732  ;;  %v1982_v37 = vmul.f32 %v1980_v17, %v3380_v7 }
 0x5ed   : > { %v2002_v51 = vadd.f32 %v2000_v36, %v1994_v48  ;;  %v1961_v36 = vmul.f32 %v3475_v10, %v3382_v41  ;;  %v2735_v17 = vpop.eup %2734 }
 0x5ee   : > { %v2014_v8 = vmul.f32 %v2723_v58, %v2001_v39  ;;  %v2003_v27 = vmul.f32 %v2001_v39, %v3378_v20  ;;  %v2737_v5 = vpop.eup %2736  ;;  %v1985_v39 = vsel %vm527_vm2, %v1983_v1, 0.0 }
 0x5ef   : > { %v2015_v33 = vmul.f32 %v2725_v4, %v2002_v51  ;;  %v2004_v62 = vmul.f32 %v2002_v51, %v1687_v57  ;;  %v1963_v4 = vsel %vm527_vm2, %v1961_v36, 0.0 }
 0x5f0   : > { %v2022_v3 = vadd.f32 %v2020_v14, %v2014_v8  ;;  %v2005_v41 = vsel %vm527_vm2, %v2003_v27, 0.0 }
 0x5f1   : > { %v2023_v24 = vadd.f32 %v2021_v60, %v2015_v33  ;;  %v2006_v10 = vsel %vm527_vm2, %v2004_v62, 0.0  ;;  %v2739_v33 = vpop.eup %2738 }
 0x5f2   : > { %v2035_v26 = vmul.f32 %v2727_v45, %v2022_v3  ;;  %v2024_v32 = vmul.f32 %v2022_v3, %v3376_v31  ;;  %v1703_v31 = vpop.permute.xlu0 %1702 }
 0x5f3   : > { %v2036_v44 = vmul.f32 %v2729_v47, %v2023_v24  ;;  %v2025_v42 = vmul.f32 %v2023_v24, %v1679_v35  ;;  %v1962_v12 = vmul.f32 %v3478_v16, %v1703_v31  ;;  %v2741_v45 = vpop.eup %2740 }
 0x5f4   : > { %v2043_v18 = vadd.f32 %v2041_v28, %v2035_v26  ;;  %v2026_v53 = vsel %vm527_vm2, %v2024_v32, 0.0 }
 0x5f5   : > { %v2044_v21 = vadd.f32 %v2042_v15, %v2036_v44  ;;  %v2027_v7 = vsel %vm527_vm2, %v2025_v42, 0.0  ;;  %v1964_v8 = vsel %vm527_vm2, %v1962_v12, 0.0 }
 0x5f6   : > { %v2045_v35 = vmul.f32 %v2043_v18, %v3374_v63  ;;  %v2056_v59 = vmul.f32 %v2731_v2, %v2043_v18  ;;  %v2028_v14 = vadd.f32 %v2027_v7, %v2026_v53  ;;  %v1965_v15 = vadd.f32 %v1964_v8, %v1963_v4 }
 0x5f7   : > { %v2046_v30 = vmul.f32 %v2044_v21, %v3464_v52  ;;  %v2057_v48 = vmul.f32 %v2733_v11, %v2044_v21  ;;  %v1984_v52 = vsel %vm527_vm2, %v1982_v37, 0.0 }
 0x5f8   : > { %v2047_v20 = vsel %vm527_vm2, %v2045_v35, 0.0  ;;  %v2064_v57 = vadd.f32 %v2062_v25, %v2056_v59  ;;  %v1986_v40 = vadd.f32 %v1985_v39, %v1984_v52  ;;  %v2029_v25 = vrot.slane %v2028_v14, 4 }
 0x5f9   : > { %v2048_v55 = vsel %vm527_vm2, %v2046_v30, 0.0  ;;  %v2065_v63 = vadd.f32 %v2063_v22, %v2057_v48 }
 0x5fa   : > { %v2066_v16 = vmul.f32 %v2064_v57, %v3372_v43  ;;  %v2077_v49 = vmul.f32 %v2735_v17, %v2064_v57  ;;  %v2049_v54 = vadd.f32 %v2048_v55, %v2047_v20  ;;  %v2007_v43 = vadd.f32 %v2006_v10, %v2005_v41 }
 0x5fb   : > { %v2067_v58 = vmul.f32 %v2065_v63, %v3451_v46  ;;  %v2078_v51 = vmul.f32 %v2737_v5, %v2065_v63  ;;  %v2105_v46 = vmul.f32 %v2103_v50, %v3426_v34  ;;  %v1987_v11 = vrot.slane %v1986_v40, 4 }
 0x5fc   : > { %v2068_v60 = vsel %vm527_vm2, %v2066_v16, 0.0  ;;  %v2085_v3 = vadd.f32 %v2083_v13, %v2077_v49  ;;  %v2050_v32 = vrot.slane %v2049_v54, 4  ;;  %v2008_v21 = vrot.slane %v2007_v43, 4 }
 0x5fd   : > { %v2069_v38 = vsel %vm527_vm2, %v2067_v58, 0.0  ;;  %v2086_v0 = vadd.f32 %v2084_v19, %v2078_v51  ;;  %v1966_v50 = vrot.slane %v1965_v15, 4  ;;  %v2030_v27 = vadd.f32 %v2029_v25, %v2028_v14 }
 0x5fe   : > { %v2070_v24 = vadd.f32 %v2069_v38, %v2068_v60  ;;  %v2087_v47 = vmul.f32 %v2085_v3, %v3370_v9  ;;  %v2098_v26 = vmul.f32 %v2739_v33, %v2085_v3  ;;  %v2051_v37 = vadd.f32 %v2050_v32, %v2049_v54 }
 0x5ff   : > { %v2088_v28 = vmul.f32 %v2086_v0, %v3443_v61  ;;  %v2099_v44 = vmul.f32 %v2741_v45, %v2086_v0  ;;  %v2009_v35 = vadd.f32 %v2008_v21, %v2007_v43  ;;  %v1988_v59 = vadd.f32 %v1987_v11, %v1986_v40 }
 0x600   : > { %v2071_v42 = vrot.slane %v2070_v24, 4  ;;  %v2089_v22 = vsel %vm527_vm2, %v2087_v47, 0.0  ;;  %v2106_v2 = vadd.f32 %v2104_v23, %v2098_v26  ;;  %v1967_v36 = vadd.f32 %v1966_v50, %v1965_v15 }
 0x601   : > { %v2090_v13 = vsel %vm527_vm2, %v2088_v28, 0.0  ;;  %v2107_v18 = vadd.f32 %v2105_v46, %v2099_v44  ;;  %v2052_v12 = vrot.slane %v2051_v37, 2  ;;  %v2010_v17 = vrot.slane %v2009_v35, 2 }
 0x602   : > { %v2091_v19 = vadd.f32 %v2090_v13, %v2089_v22  ;;  %v2072_v34 = vadd.f32 %v2071_v42, %v2070_v24  ;;  %v2108_v9 = vmul.f32 %v2106_v2, %v3368_v56  ;;  %v2031_v56 = vrot.slane %v2030_v27, 2  ;;  %v2407_v42 = vld [vmem:[%s3604_s8 + $0x1] ss:$0 sm:$0xff] }
 0x603   : > { %v2109_v61 = vmul.f32 %v2107_v18, %v3436_v29  ;;  %v1989_v55 = vrot.slane %v1988_v59, 2  ;;  %v1968_v63 = vrot.slane %v1967_v36, 2  ;;  %v2053_v5 = vadd.f32 %v2052_v12, %v2051_v37  ;;  %v2137_v18 = vld [vmem:[#allocation4] sm:$0xff] }
 0x604   : > { %v2092_v1 = vrot.slane %v2091_v19, 4  ;;  %v2110_v62 = vsel %vm527_vm2, %v2108_v9, 0.0  ;;  %v2073_v48 = vrot.slane %v2072_v34, 2  ;;  %v2032_v39 = vadd.f32 %v2031_v56, %v2030_v27 }
 0x605   : > { %v2111_v31 = vsel %vm527_vm2, %v2109_v61, 0.0  ;;  %v2011_v41 = vadd.f32 %v2010_v17, %v2009_v35  ;;  %v1990_v58 = vadd.f32 %v1989_v55, %v1988_v59  ;;  %v1969_v51 = vadd.f32 %v1968_v63, %v1967_v36  ;;  %v2413_v36 = vld [vmem:[%s3606_s10] ss:$0 sm:$0xff] }
 0x606   : > { %v2093_v30 = vadd.f32 %v2092_v1, %v2091_v19  ;;  %v2112_v23 = vadd.f32 %v2111_v31, %v2110_v62  ;;  %v2074_v57 = vadd.f32 %v2073_v48, %v2072_v34  ;;  %v2054_v4 = vrot.slane %v2053_v5, 1  ;;  %v2207_v34 = vld [vmem:[#allocation7] sm:$0xff] }
 0x607   : > { %v2033_v14 = vrot.slane %v2032_v39, 1  ;;  %v2012_v54 = vrot.slane %v2011_v41, 1  ;;  %v1991_v38 = vrot.slane %v1990_v58, 1  ;;  %v1970_v0 = vrot.slane %v1969_v51, 1 }
 0x608   : > { %v2094_v53 = vrot.slane %v2093_v30, 2  ;;  %v2113_v7 = vrot.slane %v2112_v23, 4  ;;  %v2075_v49 = vrot.slane %v2074_v57, 1  ;;  %v2055_v45 = vadd.f32 %v2054_v4, %v2053_v5 }
 0x609   : > { %v2034_v43 = vadd.f32 %v2033_v14, %v2032_v39  ;;  %v2013_v46 = vadd.f32 %v2012_v54, %v2011_v41  ;;  %v1992_v28 = vadd.f32 %v1991_v38, %v1990_v58  ;;  %v1971_v44 = vadd.f32 %v1970_v0, %v1969_v51 }
 0x60a   : > { %v2095_v29 = vadd.f32 %v2094_v53, %v2093_v30  ;;  %v2114_v20 = vadd.f32 %v2113_v7, %v2112_v23  ;;  %v2076_v3 = vadd.f32 %v2075_v49, %v2074_v57  ;;  %v2135_v22 = vmul.f32 %v2407_v42, %v3453_v6  ;;  %v2414_v53 = vld [vmem:[%s3607_s11] ss:$0 sm:$0xff] }
 0x60c   : > { %v2115_v52 = vrot.slane %v2114_v20, 2  ;;  %v2096_v10 = vrot.slane %v2095_v29, 1 }
 0x60e   : > { %v2116_v16 = vadd.f32 %v2115_v52, %v2114_v20  ;;  %v2097_v33 = vadd.f32 %v2096_v10, %v2095_v29 }
 0x610   : > { %v2117_v8 = vrot.slane %v2116_v16, 1 }
 0x612   : > { %v2118_v60 = vadd.f32 %v2117_v8, %v2116_v16 }
 0x614   : > { %v2119_v40 = vsel %vm1213_vm6, %v2118_v60, %v2097_v33 }
 0x615   : > { %v2120_v24 = vsel %vm1215_vm7, %v2119_v40, %v2076_v3 }
 0x616   : > { %v2121_v47 = vsel %vm1217_vm8, %v2120_v24, %v2055_v45 }
 0x617   : > { %v2122_v26 = vsel %vm1219_vm9, %v2121_v47, %v2034_v43 }
 0x618   : > { %v2123_v15 = vsel %vm1221_vm10, %v2122_v26, %v2013_v46 }
 0x619   : > { %v2124_v25 = vsel %vm1223_vm11, %v2123_v15, %v1992_v28 }
 0x61a   : > { %v2125_v32 = vsel %vm1225_vm12, %v2124_v25, %v1971_v44 }
 0x61b   : > { %2126 = vst.msk [vmem:[#allocation5] sm:$0xff] %vm527_vm2, %v2125_v32 }
 0x622   : > { %v2127_v13 = vld [vmem:[#allocation5] sm:$0xff] }
 0x623   : > { %v2136_v2 = vadd.f32 %v2135_v22, %v2127_v13 }
 0x625   : > { %v2138_v21 = vmul.f32 %v2137_v18, %v2136_v2 }
 0x627   : > { %v2139_v19 = vpack.c.bf16 %v2138_v21, %v2138_v21 }
 0x629   : > { %2564 = vmatmul.mubr.msk.bf16.vlgmr.msra.gmra.mxu0 %vm527_vm2, %v2139_v19 }
 0x6e9   : > { %v2201_v11 = vpop.f32.mrf.mxu0 }
 0x6ea   : > { %v2208_v9 = vadd.f32 %v2207_v34, %v2201_v11 }
 0x6eb   : > { %v2565_v61 = vpop.f32.mrf.mxu0 }
 0x6ec   : > { %v2209_v50 = vsel %vm472_vm1, %v2208_v9, 0.0 }
 0x6ed   : > { %2210 = vadd.xlane.f32.xlu0 %v2209_v50  ;;  %v2204_v37 = vpop.f32.mrf.mxu0 }
 0x6ef   : > { %v2566_v1 = vpop.f32.mrf.mxu0 }
 0x776   : > { %v2211_v27 = vpop.xlane.xlu0 %2210 }
 0x777   : > { %v2213_v6 = vmul.f32 0.03125, %v2211_v27 }
 0x779   : > { %v2214_v62 = vsub.f32 %v2208_v9, %v2213_v6 }
 0x77b   : > { %v2215_v31 = vmul.f32 %v2214_v62, %v2214_v62 }
 0x77d   : > { %v2216_v35 = vsel %vm472_vm1, %v2215_v31, 0.0 }
 0x77e   : > { %2217 = vadd.xlane.f32.xlu1 %v2216_v35 }
 0x807   : > { %v2218_v30 = vpop.xlane.xlu1 %2217 }
 0x808   : > { %v2219_v23 = vmul.f32 0.03125, %v2218_v30 }
 0x80a   : > { %v2220_v59 = vadd.f32 1e-05, %v2219_v23 }
 0x80c   : > { %2742 = vrsqrt.f32 %v2220_v59 }
 0x819   : > { %v2743_v48 = vpop.eup %2742 }
 0x81a   : > { %v2222_v12 = vmul.f32 %v2743_v48, %v2214_v62 }
 0x81c   : > { %v2230_v7 = vmul.f32 %v2413_v36, %v2222_v12 }
 0x81e   : > { %v2238_v56 = vadd.f32 %v2414_v53, %v2230_v7 }
 0x820   : > { %2239 = vst.msk [vmem:[%s404_s15] sm:$0xff] %vm472_vm1, %v2238_v56 }
 0x821   : > { %2758 = shalt.err (!%p2755_p3)
}
 0x822   : > { %s2759_s0 = scalar_lea.hbm %s2252_s2, 128  ;;  %s2763_s18 = scalar_lea.hbm %s3608_s12, 256 }
 0x823   : > { %p2760_p4 = scmp.ne.s32.totalorder %s2252_s2, %s2759_s0  ;;  %p2764_p9 = scmp.lt.s32.totalorder %s2252_s2, %s3608_s12 }
 0x824   : > { %p2765_p10 = scmp.lt.s32.totalorder %s2763_s18, %s2759_s0 }
 0x825   : > { %p2761_p7 = pnand %p2760_p4, %p2915_p5 }
 0x826   : > { %p2766_p11 = por %p2765_p10, %p2764_p9 }
 0x827   : > { %p2762_p8 = pneg %p2761_p7 }
 0x829   : > { %p2767_p12 = pnand %p2766_p11, %p2762_p8 }
 0x82b   : > { %2770 = shalt.err (!%p2767_p12)
}
 0x82c   : > { %2567 = dma.vmem_to_hbm [thread:$0]  (%p2915_p5), %s2255_s16, 128, %s2252_s2, %s2241_s3  }
 0x82d PF: > { %p2573_p13 = scmp.ge.s32.totalorder %s2805_s24, 2  ;;  %s2266_s15 = sand.u32 1, %s2793_s21  }
 0x82e   : > { %s2267_s20 = scalar_lea.sflag [#allocation9], %s2266_s15 }
 0x82f   : > { %p2570_p0 = pnand %p2573_p13, %p2919_p6 }
 0x831   : > { %p2571_p1 = pneg %p2570_p0 }
 0x833   : > { %2788 = dma.done.wait (%p2571_p1), %s2267_s20, 128  }
 0x834   : > { %2790 = vsyncadd (%p2571_p1), %s2267_s20, 4294967168  ;;  %p22_p2 = scmp.ge.s32.totalorder %s2902_s27, 4   ;;  %s3621_s21 = smov %s2797_s22 }
 0x835   : > { %s3622_s22 = smov %s2801_s23  ;;  %s3623_s23 = smov %s2913_s30 }
 0x836   : > { %s3624_s24 = smov %s2902_s27  ;;  %24 = sbr.rel (!%p22_p2) target bundleno = 8 (0x8), region = 112 }
 0x83b   :  { %2272 = vsyncpa [#allocation9], 1 }
 0x83c   :  { %2274 = vsyncpa [#allocation9 + $0x1], 1 }

</bundles_post_ra>
